<compile_context>
chip_gen: v7x
topology: tpu7x:2x2x1
jax: 0.10.0
libtpu: 0.0.40
codegen_flags: <defaults>
</compile_context>

<pallas_src>
import functools

import jax
import jax.numpy as jnp
from jax import lax
from jax.experimental import pallas as pl
from jax.experimental.pallas import tpu as pltpu


def _round_up(v, m):
    return (v + m - 1) // m * m


def _spec(shape, index_map, *, buffers=None):
    """BlockSpec, optionally with deeper pipelining (fallback if unsupported)."""
    if buffers is None:
        return pl.BlockSpec(shape, index_map)
    try:
        return pl.BlockSpec(shape, index_map, pipeline_mode=pl.Buffered(buffers))
    except Exception:  # older jax without pipeline_mode / Buffered
        return pl.BlockSpec(shape, index_map)


# --------------------------------------------------------------------------- #
# Kernels
# --------------------------------------------------------------------------- #
def _setup_deg_kernel(a_ref, x_ref, w0_ref, b_ref,
                      u0_ref, dinv_ref, out0_ref,
                      deg_acc,
                      *, add_self_loops, mxu_dtype):
    """Hop 0 with on-the-fly degrees.

    deg = rowsum(A [+I folded on host]),  dinv = deg^{-1/2},
    u_0 = dinv * x,  out = x @ W_0 + b.
    """
    j = pl.program_id(1)
    nj = pl.num_programs(1)

    @pl.when(j == 0)
    def _():
        deg_acc[...] = jnp.zeros_like(deg_acc)

    # Row sums on the MXU (ones RHS) — avoids a full-tile VPU cast + XLU
    # cross-lane reduce, which is real work on v5e; A cast from its narrow
    # HBM storage dtype happens here, after the tile is already in VMEM.
    ones_rhs = jnp.ones((a_ref.shape[1], 128), mxu_dtype)
    deg_acc[...] += jnp.dot(a_ref[...].astype(mxu_dtype), ones_rhs,
                            preferred_element_type=jnp.float32)

    @pl.when(j == nj - 1)
    def _():
        x = x_ref[...].astype(jnp.float32)
        deg = deg_acc[:, 0:1]
        if add_self_loops:
            # Identity folded into A on the host (padded diagonal included),
            # so deg >= 1 everywhere — no where() guard, no inf/NaN.
            dinv = lax.rsqrt(deg)
        else:
            dinv = jnp.where(deg > 0.0, lax.rsqrt(deg), 0.0)
        dinv_ref[...] = dinv
        u0_ref[...] = (dinv * x).astype(u0_ref.dtype)          # u_0 = dinv * x
        out0_ref[...] = (
            jnp.dot(x.astype(mxu_dtype), w0_ref[...],
                    preferred_element_type=jnp.float32) + b_ref[...]
        ).astype(out0_ref.dtype)


def _setup_dinv_kernel(dinv_ref, x_ref, w0_ref, b_ref,
                       u0_ref, out0_ref, *, mxu_dtype):
    """Hop 0 with a precomputed dinv (or all-ones when normalize=False).

    Skips the degree pass, i.e. one full HBM stream of A (~1/(K+1) of traffic).
    """
    x = x_ref[...].astype(jnp.float32)
    u0_ref[...] = (dinv_ref[...] * x).astype(u0_ref.dtype)
    out0_ref[...] = (
        jnp.dot(x.astype(mxu_dtype), w0_ref[...],
                preferred_element_type=jnp.float32) + b_ref[...]
    ).astype(out0_ref.dtype)


def _prop_kernel(a_ref, ucol_ref, dinv_ref, wk_ref, outin_ref,
                 unext_ref, outnext_ref,
                 acc_ref,
                 *, mxu_dtype):
    """One hop: h_k = dinv * (A_folded @ u_{k-1});  out += h_k @ W_k.

    u = dinv * h is carried between hops and the self-loop (when requested) is
    folded into A on the host, so each hop is a single tiled [N,N]@[N,F] pass.
    A is stored narrow (int8 by default) in HBM and cast to the MXU dtype right
    after the tile lands in VMEM.
    """
    j = pl.program_id(1)
    nj = pl.num_programs(1)

    @pl.when(j == 0)
    def _():
        acc_ref[...] = jnp.zeros_like(acc_ref)

    acc_ref[...] += jnp.dot(a_ref[...].astype(mxu_dtype), ucol_ref[...],
                            preferred_element_type=jnp.float32)

    @pl.when(j == nj - 1)
    def _():
        dinv = dinv_ref[...]                                   # ones if normalize=False
        h = dinv * acc_ref[...]                                # h_k        (f32)
        unext_ref[...] = (dinv * h).astype(unext_ref.dtype)    # u_k = dinv*h_k
        outnext_ref[...] = (
            outin_ref[...]
            + jnp.dot(h.astype(mxu_dtype), wk_ref[...],
                      preferred_element_type=jnp.float32)
        ).astype(outnext_ref.dtype)


# --------------------------------------------------------------------------- #
# Wrapper
# --------------------------------------------------------------------------- #
def tagconv_forward(x, adj, weight, bias=None, *, K=2, add_self_loops=True,
                    normalize=True, dinv=None,
                    mxu_dtype=jnp.bfloat16, adj_dtype=jnp.int8,
                    block_m=1024, block_k=1024, a_buffers=3,
                    vmem_limit_bytes=None):
    """TAGConv forward on a dense adjacency.

    x: [N, F_in], adj: [N, N], weight: [F_in*(K+1), C_out], bias: [C_out] | None.

    adj_dtype : HBM storage dtype for the (self-loop-folded) adjacency. The
        default int8 assumes an unweighted (0/1) adjacency and halves the
        dominant HBM stream vs bf16; pass adj_dtype=mxu_dtype (or float32) for
        weighted graphs.
    dinv : optional precomputed [N] / [N,1] vector deg(A [+I])^{-1/2}. Supplying
        it (e.g. cached across steps on a fixed graph) skips the degree pass.
    """
    N, F_in = x.shape
    C_out = weight.shape[1]
    assert weight.shape[0] == F_in * (K + 1)
    if bias is None:
        bias = jnp.zeros((C_out,), jnp.float32)

    # ---- tile / lane geometry ------------------------------------------------
    Fp = _round_up(F_in, 128)                   # padded hop-feature width
    Cp = _round_up(C_out, 128)                  # padded output width (unmasked vst)
    Nr = _round_up(N, 128)
    bm = max(128, min(block_m, Nr) // 128 * 128)
    if Nr >= 256:                               # keep >= 2 "parallel" row blocks so
        bm = min(bm, max(128, (Nr // 2) // 128 * 128))   # v7x's 2nd TC gets work
    Np = _round_up(Nr, bm)
    bk = max(128, min(block_k, Np) // 128 * 128)
    while Np % bk:                              # bk must tile Np exactly
        bk -= 128
    n_rb, n_cb = Np // bm, Np // bk
    a_buf = a_buffers if (a_buffers and n_rb * n_cb >= a_buffers) else None

    # ---- host-side packing ----------------------------------------------------
    x_p = jnp.pad(x.astype(jnp.float32), ((0, Np - N), (0, Fp - F_in)))
    a_p = jnp.pad(adj, ((0, Np - N), (0, Np - N))).astype(adj_dtype)
    if normalize and add_self_loops:
        # Fold the self-loop into A (padded diagonal too, so padded rows keep
        # deg >= 1 and never produce inf/NaN through the MXU). XLA fuses the
        # eye into the existing pad/convert.
        a_p = a_p + jnp.eye(Np, dtype=adj_dtype)
    w_p = jnp.pad(weight.reshape(K + 1, F_in, C_out),
                  ((0, 0), (0, Fp - F_in), (0, Cp - C_out))).astype(mxu_dtype)
    b_p = jnp.pad(bias.astype(jnp.float32), (0, Cp - C_out)).reshape(1, Cp)

    if not normalize:
        dinv_arr = jnp.ones((N, 1), jnp.float32)     # no normalization, no self-loop
    elif dinv is not None:
        dinv_arr = jnp.asarray(dinv, jnp.float32).reshape(N, 1)
    else:
        dinv_arr = None                              # compute inside the setup kernel

    def cparams(sem):
        kw = dict(dimension_semantics=sem)
        if vmem_limit_bytes is not None:
            kw["vmem_limit_bytes"] = vmem_limit_bytes
        return pltpu.CompilerParams(**kw)

    # ---- hop 0 -----------------------------------------------------------------
    if dinv_arr is None:
        setup = pl.pallas_call(
            functools.partial(_setup_deg_kernel, add_self_loops=add_self_loops,
                              mxu_dtype=mxu_dtype),
            grid=(n_rb, n_cb),
            in_specs=[
                _spec((bm, bk), lambda i, j: (i, j), buffers=a_buf),   # A tile
                pl.BlockSpec((bm, Fp), lambda i, j: (i, 0)),           # x row block
                pl.BlockSpec((Fp, Cp), lambda i, j: (0, 0)),           # W_0 (resident)
                pl.BlockSpec((1, Cp), lambda i, j: (0, 0)),            # bias (resident)
            ],
            out_specs=(
                pl.BlockSpec((bm, Fp), lambda i, j: (i, 0)),           # u_0
                pl.BlockSpec((bm, 1), lambda i, j: (i, 0)),            # dinv
                pl.BlockSpec((bm, Cp), lambda i, j: (i, 0)),           # out accumulator
            ),
            out_shape=(
                jax.ShapeDtypeStruct((Np, Fp), mxu_dtype),
                jax.ShapeDtypeStruct((Np, 1), jnp.float32),
                jax.ShapeDtypeStruct((Np, Cp), jnp.float32),
            ),
            scratch_shapes=[pltpu.VMEM((bm, 128), jnp.float32)],       # deg (MXU cols)
            compiler_params=cparams(("parallel", "arbitrary")),
        )
        u, dinv_p, out_acc = setup(a_p, x_p, w_p[0], b_p)
    else:
        dinv_p = jnp.pad(dinv_arr, ((0, Np - N), (0, 0)))
        setup = pl.pallas_call(
            functools.partial(_setup_dinv_kernel, mxu_dtype=mxu_dtype),
            grid=(n_rb,),
            in_specs=[
                pl.BlockSpec((bm, 1), lambda i: (i, 0)),               # dinv
                pl.BlockSpec((bm, Fp), lambda i: (i, 0)),              # x row block
                pl.BlockSpec((Fp, Cp), lambda i: (0, 0)),              # W_0
                pl.BlockSpec((1, Cp), lambda i: (0, 0)),               # bias
            ],
            out_specs=(
                pl.BlockSpec((bm, Fp), lambda i: (i, 0)),              # u_0
                pl.BlockSpec((bm, Cp), lambda i: (i, 0)),              # out accumulator
            ),
            out_shape=(
                jax.ShapeDtypeStruct((Np, Fp), mxu_dtype),
                jax.ShapeDtypeStruct((Np, Cp), jnp.float32),
            ),
            compiler_params=cparams(("parallel",)),
        )
        u, out_acc = setup(dinv_p, x_p, w_p[0], b_p)

    # ---- hops 1..K: propagate + accumulate projection in place -----------------
    if K > 0:
        prop = pl.pallas_call(
            functools.partial(_prop_kernel, mxu_dtype=mxu_dtype),
            grid=(n_rb, n_cb),
            in_specs=[
                _spec((bm, bk), lambda i, j: (i, j), buffers=a_buf),   # A tile
                pl.BlockSpec((bk, Fp), lambda i, j: (j, 0)),           # u_{k-1} (reduction side)
                pl.BlockSpec((bm, 1), lambda i, j: (i, 0)),            # dinv row block
                pl.BlockSpec((Fp, Cp), lambda i, j: (0, 0)),           # W_k (resident)
                pl.BlockSpec((bm, Cp), lambda i, j: (i, 0)),           # out accumulator (in)
            ],
            out_specs=(
                pl.BlockSpec((bm, Fp), lambda i, j: (i, 0)),           # u_k
                pl.BlockSpec((bm, Cp), lambda i, j: (i, 0)),           # out accumulator (out)
            ),
            out_shape=(
                jax.ShapeDtypeStruct((Np, Fp), mxu_dtype),
                jax.ShapeDtypeStruct((Np, Cp), jnp.float32),
            ),
            scratch_shapes=[pltpu.VMEM((bm, Fp), jnp.float32)],
            input_output_aliases={4: 1},                               # out in place
            compiler_params=cparams(("parallel", "arbitrary")),
        )
        for k in range(1, K + 1):
            u, out_acc = prop(a_p, u, dinv_p, w_p[k], out_acc)

    return out_acc[:N, :C_out].astype(x.dtype)


# --------------------------------------------------------------------------- #
# Reference + demo
# --------------------------------------------------------------------------- #
def _reference(x, adj, weight, bias, K=2, add_self_loops=True, normalize=True):
    a = adj
    if normalize:
        if add_self_loops:
            a = a + jnp.eye(a.shape[0], dtype=a.dtype)
        deg = a.sum(-1, keepdims=True)
        dinv = jnp.where(deg > 0, deg ** -0.5, 0.0)
        a = dinv * a * dinv.T
    xs = [x]
    h = x
    for _ in range(K):
        h = a @ h
        xs.append(h)
    return jnp.concatenate(xs, axis=-1) @ weight + bias


def _binary_adj(key, n, p=0.05):
    a = (jax.random.uniform(key, (n, n)) < p).astype(jnp.float32)
    a = jnp.maximum(a, a.T)
    return a * (1.0 - jnp.eye(n, dtype=jnp.float32))


if __name__ == "__main__":
    key = jax.random.PRNGKey(0)
    k_x, k_a, k_w, k_x2, k_a2, k_w2, k_b2 = jax.random.split(key, 7)

    # ---- example 1: N=128 nodes, 16 in-features, 32 out, K=2 -------------------
    N, F_IN, C_OUT, K = 128, 16, 32, 2
    x = jax.random.normal(k_x, (N, F_IN), dtype=jnp.float32)
    adj = _binary_adj(k_a, N)
    fan_in = F_IN * (K + 1)
    limit = (6.0 / (fan_in + C_OUT)) ** 0.5
    weight = jax.random.uniform(k_w, (fan_in, C_OUT), dtype=jnp.float32,
                                minval=-limit, maxval=limit)
    bias = jnp.zeros((C_OUT,), dtype=jnp.float32)
    ref = _reference(x, adj, weight, bias, K=K)

    # exact path: f32 MXU, f32 adjacency storage
    fwd_f32 = jax.jit(functools.partial(tagconv_forward, K=K,
                                        mxu_dtype=jnp.float32,
                                        adj_dtype=jnp.float32))
    out_f32 = jax.block_until_ready(fwd_f32(x, adj, weight, bias))
    assert out_f32.shape == (N, C_OUT)
    assert jnp.allclose(out_f32, ref, atol=1e-3, rtol=1e-3), "f32 mismatch vs reference"

    # perf path: int8 adjacency in HBM (in-kernel cast), bf16 MXU, f32 accumulators
    fwd_fast = jax.jit(functools.partial(tagconv_forward, K=K,
                                         mxu_dtype=jnp.bfloat16,
                                         adj_dtype=jnp.int8))
    out_fast = jax.block_until_ready(fwd_fast(x, adj, weight, bias))
    assert out_fast.shape == (N, C_OUT)
    assert jnp.allclose(out_fast, ref, atol=5e-2, rtol=5e-2), "int8/bf16 mismatch vs reference"

    # cached-normalization path: precomputed dinv skips the degree pass over A
    deg = (adj + jnp.eye(N, dtype=jnp.float32)).sum(-1)
    dinv_cached = deg ** -0.5
    fwd_cached = jax.jit(functools.partial(tagconv_forward, K=K,
                                           mxu_dtype=jnp.float32,
                                           adj_dtype=jnp.float32,
                                           dinv=dinv_cached))
    out_cached = jax.block_until_ready(fwd_cached(x, adj, weight, bias))
    assert jnp.allclose(out_cached, ref, atol=1e-3, rtol=1e-3), "cached-dinv mismatch"

    # ---- example 2: ragged sizes (padding + multi row-block grid), K=3 ---------
    N2, F2, C2, K2 = 300, 20, 7, 3
    x2 = jax.random.normal(k_x2, (N2, F2), dtype=jnp.float32)
    adj2 = _binary_adj(k_a2, N2)
    w2 = jax.random.uniform(k_w2, (F2 * (K2 + 1), C2), dtype=jnp.float32,
                            minval=-0.2, maxval=0.2)
    b2 = 0.1 * jax.random.normal(k_b2, (C2,), dtype=jnp.float32)
    ref2 = _reference(x2, adj2, w2, b2, K=K2)

    fwd2 = jax.jit(functools.partial(tagconv_forward, K=K2,
                                     mxu_dtype=jnp.float32,
                                     adj_dtype=jnp.float32))
    out2 = jax.block_until_ready(fwd2(x2, adj2, w2, b2))
    assert out2.shape == (N2, C2)
    assert jnp.allclose(out2, ref2, atol=1e-3, rtol=1e-3), "padded-case mismatch vs reference"

    print("KERNEL_OK")
</pallas_src>

<mosaic_0001>
module attributes {stable_mosaic.version = 11 : i64} {
  func.func @_prop_kernel(%arg0: i32, %arg1: i32, %arg2: memref<128x128xf32, #tpu.memory_space<vmem>>, %arg3: memref<128x128xf32, #tpu.memory_space<vmem>>, %arg4: memref<128x1xf32, #tpu.memory_space<vmem>>, %arg5: memref<128x128xf32, #tpu.memory_space<vmem>>, %arg6: memref<128x128xf32, #tpu.memory_space<vmem>>, %arg7: memref<128x128xf32, #tpu.memory_space<vmem>>, %arg8: memref<128x128xf32, #tpu.memory_space<vmem>>, %arg9: memref<128x128xf32, #tpu.memory_space<vmem>>) attributes {dimension_semantics = [#tpu.dimension_semantics<parallel>, #tpu.dimension_semantics<arbitrary>], iteration_bounds = array<i64: 1, 1>, scalar_prefetch = 0 : i64, scratch_operands = 1 : i64, tpu.core_type = #tpu.core_type<tc>, window_params = [{transform_indices = @transform_0, window_bounds = array<i64: 128, 128>}, {transform_indices = @transform_1, window_bounds = array<i64: 128, 128>}, {transform_indices = @transform_2, window_bounds = array<i64: 128, 1>}, {pipeline_mode = #tpu.pipeline_mode<synchronous>, transform_indices = @transform_3, window_bounds = array<i64: 128, 128>}, {transform_indices = @transform_4, window_bounds = array<i64: 128, 128>}, {transform_indices = @transform_5, window_bounds = array<i64: 128, 128>}, {transform_indices = @transform_6, window_bounds = array<i64: 128, 128>}]} {
    %c0_i32 = arith.constant 0 : i32
    %0 = arith.cmpi eq, %arg1, %c0_i32 : i32
    %1 = arith.extui %0 : i1 to i32
    %c0_i32_0 = arith.constant 0 : i32
    %2 = arith.cmpi ne, %1, %c0_i32_0 : i32
    scf.if %2 {
      %cst_10 = arith.constant 0.000000e+00 : f32
      %12 = vector.broadcast %cst_10 : f32 to vector<128x128xf32>
      %c0_11 = arith.constant 0 : index
      %c0_12 = arith.constant 0 : index
      %13 = vector.load %arg9[%c0_11, %c0_12] : memref<128x128xf32, #tpu.memory_space<vmem>>, vector<128x128xf32>
      tpu.vector_store %arg9[%c0_11, %c0_12], %12 {strides = array<i32>} : memref<128x128xf32, #tpu.memory_space<vmem>>, vector<128x128xf32>,
    } else {
    }
    %c0 = arith.constant 0 : index
    %c0_1 = arith.constant 0 : index
    %3 = vector.load %arg9[%c0, %c0_1] : memref<128x128xf32, #tpu.memory_space<vmem>>, vector<128x128xf32>
    %c0_2 = arith.constant 0 : index
    %c0_3 = arith.constant 0 : index
    %4 = vector.load %arg2[%c0_2, %c0_3] : memref<128x128xf32, #tpu.memory_space<vmem>>, vector<128x128xf32>
    %c0_4 = arith.constant 0 : index
    %c0_5 = arith.constant 0 : index
    %5 = vector.load %arg3[%c0_4, %c0_5] : memref<128x128xf32, #tpu.memory_space<vmem>>, vector<128x128xf32>
    %cst = arith.constant dense<0.000000e+00> : vector<128x128xf32>
    %6 = tpu.matmul %4, %5, %cst {dimension_numbers = #tpu.dot_dimension_numbers<[1], [0], [0], [1], [0, 0, 1, 1], [], []>} : vector<128x128xf32>, vector<128x128xf32>, vector<128x128xf32> -> vector<128x128xf32>
    %7 = arith.addf %3, %6 : vector<128x128xf32>
    %c0_6 = arith.constant 0 : index
    %c0_7 = arith.constant 0 : index
    %8 = vector.load %arg9[%c0_6, %c0_7] : memref<128x128xf32, #tpu.memory_space<vmem>>, vector<128x128xf32>
    tpu.vector_store %arg9[%c0_6, %c0_7], %7 {strides = array<i32>} : memref<128x128xf32, #tpu.memory_space<vmem>>, vector<128x128xf32>,
    %c0_i32_8 = arith.constant 0 : i32
    %9 = arith.cmpi eq, %arg1, %c0_i32_8 : i32
    %10 = arith.extui %9 : i1 to i32
    %c0_i32_9 = arith.constant 0 : i32
    %11 = arith.cmpi ne, %10, %c0_i32_9 : i32
    scf.if %11 {
      %c0_10 = arith.constant 0 : index
      %c0_11 = arith.constant 0 : index
      %12 = vector.load %arg4[%c0_10, %c0_11] : memref<128x1xf32, #tpu.memory_space<vmem>>, vector<128x1xf32>
      %c0_12 = arith.constant 0 : index
      %c0_13 = arith.constant 0 : index
      %13 = vector.load %arg9[%c0_12, %c0_13] : memref<128x128xf32, #tpu.memory_space<vmem>>, vector<128x128xf32>
      %14 = vector.broadcast %12 : vector<128x1xf32> to vector<128x128xf32>
      %15 = arith.mulf %14, %13 : vector<128x128xf32>
      %16 = vector.broadcast %12 : vector<128x1xf32> to vector<128x128xf32>
      %17 = arith.mulf %16, %15 : vector<128x128xf32>
      %c0_14 = arith.constant 0 : index
      %c0_15 = arith.constant 0 : index
      %18 = vector.load %arg7[%c0_14, %c0_15] : memref<128x128xf32, #tpu.memory_space<vmem>>, vector<128x128xf32>
      tpu.vector_store %arg7[%c0_14, %c0_15], %17 {strides = array<i32>} : memref<128x128xf32, #tpu.memory_space<vmem>>, vector<128x128xf32>,
      %c0_16 = arith.constant 0 : index
      %c0_17 = arith.constant 0 : index
      %19 = vector.load %arg6[%c0_16, %c0_17] : memref<128x128xf32, #tpu.memory_space<vmem>>, vector<128x128xf32>
      %c0_18 = arith.constant 0 : index
      %c0_19 = arith.constant 0 : index
      %20 = vector.load %arg5[%c0_18, %c0_19] : memref<128x128xf32, #tpu.memory_space<vmem>>, vector<128x128xf32>
      %cst_20 = arith.constant dense<0.000000e+00> : vector<128x128xf32>
      %21 = tpu.matmul %15, %20, %cst_20 {dimension_numbers = #tpu.dot_dimension_numbers<[1], [0], [0], [1], [0, 0, 1, 1], [], []>} : vector<128x128xf32>, vector<128x128xf32>, vector<128x128xf32> -> vector<128x128xf32>
      %22 = arith.addf %19, %21 : vector<128x128xf32>
      %c0_21 = arith.constant 0 : index
      %c0_22 = arith.constant 0 : index
      %23 = vector.load %arg8[%c0_21, %c0_22] : memref<128x128xf32, #tpu.memory_space<vmem>>, vector<128x128xf32>
      tpu.vector_store %arg8[%c0_21, %c0_22], %22 {strides = array<i32>} : memref<128x128xf32, #tpu.memory_space<vmem>>, vector<128x128xf32>,
    } else {
    }
    return
  }
  func.func @transform_0(%arg0: i32, %arg1: i32) -> (i32, i32) {
    %c0_i32 = arith.constant 0 : i32
    return %arg0, %arg1 : i32, i32
  }
  func.func @transform_1(%arg0: i32, %arg1: i32) -> (i32, i32) {
    %c0_i32 = arith.constant 0 : i32
    %c0_i32_0 = arith.constant 0 : i32
    return %arg1, %c0_i32 : i32, i32
  }
  func.func @transform_2(%arg0: i32, %arg1: i32) -> (i32, i32) {
    %c0_i32 = arith.constant 0 : i32
    %c0_i32_0 = arith.constant 0 : i32
    return %arg0, %c0_i32 : i32, i32
  }
  func.func @transform_3(%arg0: i32, %arg1: i32) -> (i32, i32) {
    %c0_i32 = arith.constant 0 : i32
    %c0_i32_0 = arith.constant 0 : i32
    %c0_i32_1 = arith.constant 0 : i32
    return %c0_i32, %c0_i32_0 : i32, i32
  }
  func.func @transform_4(%arg0: i32, %arg1: i32) -> (i32, i32) {
    %c0_i32 = arith.constant 0 : i32
    %c0_i32_0 = arith.constant 0 : i32
    return %arg0, %c0_i32 : i32, i32
  }
  func.func @transform_5(%arg0: i32, %arg1: i32) -> (i32, i32) {
    %c0_i32 = arith.constant 0 : i32
    %c0_i32_0 = arith.constant 0 : i32
    return %arg0, %c0_i32 : i32, i32
  }
  func.func @transform_6(%arg0: i32, %arg1: i32) -> (i32, i32) {
    %c0_i32 = arith.constant 0 : i32
    %c0_i32_0 = arith.constant 0 : i32
    return %arg0, %c0_i32 : i32, i32
  }
}

module attributes {stable_mosaic.version = 11 : i64} {
  func.func @_setup_deg_kernel(%arg0: i32, %arg1: i32, %arg2: memref<128x128xf32, #tpu.memory_space<vmem>>, %arg3: memref<128x128xf32, #tpu.memory_space<vmem>>, %arg4: memref<128x128xf32, #tpu.memory_space<vmem>>, %arg5: memref<1x128xf32, #tpu.memory_space<vmem>>, %arg6: memref<128x128xf32, #tpu.memory_space<vmem>>, %arg7: memref<128x1xf32, #tpu.memory_space<vmem>>, %arg8: memref<128x128xf32, #tpu.memory_space<vmem>>, %arg9: memref<128x128xf32, #tpu.memory_space<vmem>>) attributes {dimension_semantics = [#tpu.dimension_semantics<parallel>, #tpu.dimension_semantics<arbitrary>], iteration_bounds = array<i64: 1, 1>, scalar_prefetch = 0 : i64, scratch_operands = 1 : i64, tpu.core_type = #tpu.core_type<tc>, window_params = [{transform_indices = @transform_0, window_bounds = array<i64: 128, 128>}, {transform_indices = @transform_1, window_bounds = array<i64: 128, 128>}, {pipeline_mode = #tpu.pipeline_mode<synchronous>, transform_indices = @transform_2, window_bounds = array<i64: 128, 128>}, {pipeline_mode = #tpu.pipeline_mode<synchronous>, transform_indices = @transform_3, window_bounds = array<i64: 1, 128>}, {transform_indices = @transform_4, window_bounds = array<i64: 128, 128>}, {transform_indices = @transform_5, window_bounds = array<i64: 128, 1>}, {transform_indices = @transform_6, window_bounds = array<i64: 128, 128>}]} {
    %c0_i32 = arith.constant 0 : i32
    %0 = arith.cmpi eq, %arg1, %c0_i32 : i32
    %1 = arith.extui %0 : i1 to i32
    %c0_i32_0 = arith.constant 0 : i32
    %2 = arith.cmpi ne, %1, %c0_i32_0 : i32
    scf.if %2 {
      %cst_9 = arith.constant 0.000000e+00 : f32
      %12 = vector.broadcast %cst_9 : f32 to vector<128x128xf32>
      %c0_10 = arith.constant 0 : index
      %c0_11 = arith.constant 0 : index
      %13 = vector.load %arg9[%c0_10, %c0_11] : memref<128x128xf32, #tpu.memory_space<vmem>>, vector<128x128xf32>
      tpu.vector_store %arg9[%c0_10, %c0_11], %12 {strides = array<i32>} : memref<128x128xf32, #tpu.memory_space<vmem>>, vector<128x128xf32>,
    } else {
    }
    %cst = arith.constant 1.000000e+00 : f32
    %3 = vector.broadcast %cst : f32 to vector<128x128xf32>
    %c0 = arith.constant 0 : index
    %c0_1 = arith.constant 0 : index
    %4 = vector.load %arg9[%c0, %c0_1] : memref<128x128xf32, #tpu.memory_space<vmem>>, vector<128x128xf32>
    %c0_2 = arith.constant 0 : index
    %c0_3 = arith.constant 0 : index
    %5 = vector.load %arg2[%c0_2, %c0_3] : memref<128x128xf32, #tpu.memory_space<vmem>>, vector<128x128xf32>
    %cst_4 = arith.constant dense<0.000000e+00> : vector<128x128xf32>
    %6 = tpu.matmul %5, %3, %cst_4 {dimension_numbers = #tpu.dot_dimension_numbers<[1], [0], [0], [1], [0, 0, 1, 1], [], []>} : vector<128x128xf32>, vector<128x128xf32>, vector<128x128xf32> -> vector<128x128xf32>
    %7 = arith.addf %4, %6 : vector<128x128xf32>
    %c0_5 = arith.constant 0 : index
    %c0_6 = arith.constant 0 : index
    %8 = vector.load %arg9[%c0_5, %c0_6] : memref<128x128xf32, #tpu.memory_space<vmem>>, vector<128x128xf32>
    tpu.vector_store %arg9[%c0_5, %c0_6], %7 {strides = array<i32>} : memref<128x128xf32, #tpu.memory_space<vmem>>, vector<128x128xf32>,
    %c0_i32_7 = arith.constant 0 : i32
    %9 = arith.cmpi eq, %arg1, %c0_i32_7 : i32
    %10 = arith.extui %9 : i1 to i32
    %c0_i32_8 = arith.constant 0 : i32
    %11 = arith.cmpi ne, %10, %c0_i32_8 : i32
    scf.if %11 {
      %c0_9 = arith.constant 0 : index
      %c0_10 = arith.constant 0 : index
      %12 = vector.load %arg3[%c0_9, %c0_10] : memref<128x128xf32, #tpu.memory_space<vmem>>, vector<128x128xf32>
      %c0_11 = arith.constant 0 : index
      %c0_12 = arith.constant 0 : index
      %13 = vector.load %arg9[%c0_11, %c0_12] : memref<128x128xf32, #tpu.memory_space<vmem>>, vector<128x1xf32>
      %14 = math.rsqrt %13 : vector<128x1xf32>
      %c0_13 = arith.constant 0 : index
      %c0_14 = arith.constant 0 : index
      %15 = vector.load %arg7[%c0_13, %c0_14] : memref<128x1xf32, #tpu.memory_space<vmem>>, vector<128x1xf32>
      tpu.vector_store %arg7[%c0_13, %c0_14], %14 {strides = array<i32>} : memref<128x1xf32, #tpu.memory_space<vmem>>, vector<128x1xf32>,
      %16 = vector.broadcast %14 : vector<128x1xf32> to vector<128x128xf32>
      %17 = arith.mulf %16, %12 : vector<128x128xf32>
      %c0_15 = arith.constant 0 : index
      %c0_16 = arith.constant 0 : index
      %18 = vector.load %arg6[%c0_15, %c0_16] : memref<128x128xf32, #tpu.memory_space<vmem>>, vector<128x128xf32>
      tpu.vector_store %arg6[%c0_15, %c0_16], %17 {strides = array<i32>} : memref<128x128xf32, #tpu.memory_space<vmem>>, vector<128x128xf32>,
      %c0_17 = arith.constant 0 : index
      %c0_18 = arith.constant 0 : index
      %19 = vector.load %arg4[%c0_17, %c0_18] : memref<128x128xf32, #tpu.memory_space<vmem>>, vector<128x128xf32>
      %cst_19 = arith.constant dense<0.000000e+00> : vector<128x128xf32>
      %20 = tpu.matmul %12, %19, %cst_19 {dimension_numbers = #tpu.dot_dimension_numbers<[1], [0], [0], [1], [0, 0, 1, 1], [], []>} : vector<128x128xf32>, vector<128x128xf32>, vector<128x128xf32> -> vector<128x128xf32>
      %c0_20 = arith.constant 0 : index
      %c0_21 = arith.constant 0 : index
      %21 = vector.load %arg5[%c0_20, %c0_21] : memref<1x128xf32, #tpu.memory_space<vmem>>, vector<1x128xf32>
      %22 = vector.broadcast %21 : vector<1x128xf32> to vector<128x128xf32>
      %23 = arith.addf %20, %22 : vector<128x128xf32>
      %c0_22 = arith.constant 0 : index
      %c0_23 = arith.constant 0 : index
      %24 = vector.load %arg8[%c0_22, %c0_23] : memref<128x128xf32, #tpu.memory_space<vmem>>, vector<128x128xf32>
      tpu.vector_store %arg8[%c0_22, %c0_23], %23 {strides = array<i32>} : memref<128x128xf32, #tpu.memory_space<vmem>>, vector<128x128xf32>,
    } else {
    }
    return
  }
  func.func @transform_0(%arg0: i32, %arg1: i32) -> (i32, i32) {
    %c0_i32 = arith.constant 0 : i32
    return %arg0, %arg1 : i32, i32
  }
  func.func @transform_1(%arg0: i32, %arg1: i32) -> (i32, i32) {
    %c0_i32 = arith.constant 0 : i32
    %c0_i32_0 = arith.constant 0 : i32
    return %arg0, %c0_i32 : i32, i32
  }
  func.func @transform_2(%arg0: i32, %arg1: i32) -> (i32, i32) {
    %c0_i32 = arith.constant 0 : i32
    %c0_i32_0 = arith.constant 0 : i32
    %c0_i32_1 = arith.constant 0 : i32
    return %c0_i32, %c0_i32_0 : i32, i32
  }
  func.func @transform_3(%arg0: i32, %arg1: i32) -> (i32, i32) {
    %c0_i32 = arith.constant 0 : i32
    %c0_i32_0 = arith.constant 0 : i32
    %c0_i32_1 = arith.constant 0 : i32
    return %c0_i32, %c0_i32_0 : i32, i32
  }
  func.func @transform_4(%arg0: i32, %arg1: i32) -> (i32, i32) {
    %c0_i32 = arith.constant 0 : i32
    %c0_i32_0 = arith.constant 0 : i32
    return %arg0, %c0_i32 : i32, i32
  }
  func.func @transform_5(%arg0: i32, %arg1: i32) -> (i32, i32) {
    %c0_i32 = arith.constant 0 : i32
    %c0_i32_0 = arith.constant 0 : i32
    return %arg0, %c0_i32 : i32, i32
  }
  func.func @transform_6(%arg0: i32, %arg1: i32) -> (i32, i32) {
    %c0_i32 = arith.constant 0 : i32
    %c0_i32_0 = arith.constant 0 : i32
    return %arg0, %c0_i32 : i32, i32
  }
}

module attributes {stable_mosaic.version = 11 : i64} {
  func.func @_prop_kernel(%arg0: i32, %arg1: i32, %arg2: memref<128x128xf32, #tpu.memory_space<vmem>>, %arg3: memref<128x128xf32, #tpu.memory_space<vmem>>, %arg4: memref<128x1xf32, #tpu.memory_space<vmem>>, %arg5: memref<128x128xf32, #tpu.memory_space<vmem>>, %arg6: memref<128x128xf32, #tpu.memory_space<vmem>>, %arg7: memref<128x128xf32, #tpu.memory_space<vmem>>, %arg8: memref<128x128xf32, #tpu.memory_space<vmem>>, %arg9: memref<128x128xf32, #tpu.memory_space<vmem>>) attributes {dimension_semantics = [#tpu.dimension_semantics<parallel>, #tpu.dimension_semantics<arbitrary>], iteration_bounds = array<i64: 1, 1>, scalar_prefetch = 0 : i64, scratch_operands = 1 : i64, tpu.core_type = #tpu.core_type<tc>, window_params = [{transform_indices = @transform_0, window_bounds = array<i64: 128, 128>}, {transform_indices = @transform_1, window_bounds = array<i64: 128, 128>}, {transform_indices = @transform_2, window_bounds = array<i64: 128, 1>}, {pipeline_mode = #tpu.pipeline_mode<synchronous>, transform_indices = @transform_3, window_bounds = array<i64: 128, 128>}, {transform_indices = @transform_4, window_bounds = array<i64: 128, 128>}, {transform_indices = @transform_5, window_bounds = array<i64: 128, 128>}, {transform_indices = @transform_6, window_bounds = array<i64: 128, 128>}]} {
    %c0_i32 = arith.constant 0 : i32
    %0 = arith.cmpi eq, %arg1, %c0_i32 : i32
    %1 = arith.extui %0 : i1 to i32
    %c0_i32_0 = arith.constant 0 : i32
    %2 = arith.cmpi ne, %1, %c0_i32_0 : i32
    scf.if %2 {
      %cst_10 = arith.constant 0.000000e+00 : f32
      %12 = vector.broadcast %cst_10 : f32 to vector<128x128xf32>
      %c0_11 = arith.constant 0 : index
      %c0_12 = arith.constant 0 : index
      %13 = vector.load %arg9[%c0_11, %c0_12] : memref<128x128xf32, #tpu.memory_space<vmem>>, vector<128x128xf32>
      tpu.vector_store %arg9[%c0_11, %c0_12], %12 {strides = array<i32>} : memref<128x128xf32, #tpu.memory_space<vmem>>, vector<128x128xf32>,
    } else {
    }
    %c0 = arith.constant 0 : index
    %c0_1 = arith.constant 0 : index
    %3 = vector.load %arg9[%c0, %c0_1] : memref<128x128xf32, #tpu.memory_space<vmem>>, vector<128x128xf32>
    %c0_2 = arith.constant 0 : index
    %c0_3 = arith.constant 0 : index
    %4 = vector.load %arg2[%c0_2, %c0_3] : memref<128x128xf32, #tpu.memory_space<vmem>>, vector<128x128xf32>
    %c0_4 = arith.constant 0 : index
    %c0_5 = arith.constant 0 : index
    %5 = vector.load %arg3[%c0_4, %c0_5] : memref<128x128xf32, #tpu.memory_space<vmem>>, vector<128x128xf32>
    %cst = arith.constant dense<0.000000e+00> : vector<128x128xf32>
    %6 = tpu.matmul %4, %5, %cst {dimension_numbers = #tpu.dot_dimension_numbers<[1], [0], [0], [1], [0, 0, 1, 1], [], []>} : vector<128x128xf32>, vector<128x128xf32>, vector<128x128xf32> -> vector<128x128xf32>
    %7 = arith.addf %3, %6 : vector<128x128xf32>
    %c0_6 = arith.constant 0 : index
    %c0_7 = arith.constant 0 : index
    %8 = vector.load %arg9[%c0_6, %c0_7] : memref<128x128xf32, #tpu.memory_space<vmem>>, vector<128x128xf32>
    tpu.vector_store %arg9[%c0_6, %c0_7], %7 {strides = array<i32>} : memref<128x128xf32, #tpu.memory_space<vmem>>, vector<128x128xf32>,
    %c0_i32_8 = arith.constant 0 : i32
    %9 = arith.cmpi eq, %arg1, %c0_i32_8 : i32
    %10 = arith.extui %9 : i1 to i32
    %c0_i32_9 = arith.constant 0 : i32
    %11 = arith.cmpi ne, %10, %c0_i32_9 : i32
    scf.if %11 {
      %c0_10 = arith.constant 0 : index
      %c0_11 = arith.constant 0 : index
      %12 = vector.load %arg4[%c0_10, %c0_11] : memref<128x1xf32, #tpu.memory_space<vmem>>, vector<128x1xf32>
      %c0_12 = arith.constant 0 : index
      %c0_13 = arith.constant 0 : index
      %13 = vector.load %arg9[%c0_12, %c0_13] : memref<128x128xf32, #tpu.memory_space<vmem>>, vector<128x128xf32>
      %14 = vector.broadcast %12 : vector<128x1xf32> to vector<128x128xf32>
      %15 = arith.mulf %14, %13 : vector<128x128xf32>
      %16 = vector.broadcast %12 : vector<128x1xf32> to vector<128x128xf32>
      %17 = arith.mulf %16, %15 : vector<128x128xf32>
      %c0_14 = arith.constant 0 : index
      %c0_15 = arith.constant 0 : index
      %18 = vector.load %arg7[%c0_14, %c0_15] : memref<128x128xf32, #tpu.memory_space<vmem>>, vector<128x128xf32>
      tpu.vector_store %arg7[%c0_14, %c0_15], %17 {strides = array<i32>} : memref<128x128xf32, #tpu.memory_space<vmem>>, vector<128x128xf32>,
      %c0_16 = arith.constant 0 : index
      %c0_17 = arith.constant 0 : index
      %19 = vector.load %arg6[%c0_16, %c0_17] : memref<128x128xf32, #tpu.memory_space<vmem>>, vector<128x128xf32>
      %c0_18 = arith.constant 0 : index
      %c0_19 = arith.constant 0 : index
      %20 = vector.load %arg5[%c0_18, %c0_19] : memref<128x128xf32, #tpu.memory_space<vmem>>, vector<128x128xf32>
      %cst_20 = arith.constant dense<0.000000e+00> : vector<128x128xf32>
      %21 = tpu.matmul %15, %20, %cst_20 {dimension_numbers = #tpu.dot_dimension_numbers<[1], [0], [0], [1], [0, 0, 1, 1], [], []>} : vector<128x128xf32>, vector<128x128xf32>, vector<128x128xf32> -> vector<128x128xf32>
      %22 = arith.addf %19, %21 : vector<128x128xf32>
      %c0_21 = arith.constant 0 : index
      %c0_22 = arith.constant 0 : index
      %23 = vector.load %arg8[%c0_21, %c0_22] : memref<128x128xf32, #tpu.memory_space<vmem>>, vector<128x128xf32>
      tpu.vector_store %arg8[%c0_21, %c0_22], %22 {strides = array<i32>} : memref<128x128xf32, #tpu.memory_space<vmem>>, vector<128x128xf32>,
    } else {
    }
    return
  }
  func.func @transform_0(%arg0: i32, %arg1: i32) -> (i32, i32) {
    %c0_i32 = arith.constant 0 : i32
    return %arg0, %arg1 : i32, i32
  }
  func.func @transform_1(%arg0: i32, %arg1: i32) -> (i32, i32) {
    %c0_i32 = arith.constant 0 : i32
    %c0_i32_0 = arith.constant 0 : i32
    return %arg1, %c0_i32 : i32, i32
  }
  func.func @transform_2(%arg0: i32, %arg1: i32) -> (i32, i32) {
    %c0_i32 = arith.constant 0 : i32
    %c0_i32_0 = arith.constant 0 : i32
    return %arg0, %c0_i32 : i32, i32
  }
  func.func @transform_3(%arg0: i32, %arg1: i32) -> (i32, i32) {
    %c0_i32 = arith.constant 0 : i32
    %c0_i32_0 = arith.constant 0 : i32
    %c0_i32_1 = arith.constant 0 : i32
    return %c0_i32, %c0_i32_0 : i32, i32
  }
  func.func @transform_4(%arg0: i32, %arg1: i32) -> (i32, i32) {
    %c0_i32 = arith.constant 0 : i32
    %c0_i32_0 = arith.constant 0 : i32
    return %arg0, %c0_i32 : i32, i32
  }
  func.func @transform_5(%arg0: i32, %arg1: i32) -> (i32, i32) {
    %c0_i32 = arith.constant 0 : i32
    %c0_i32_0 = arith.constant 0 : i32
    return %arg0, %c0_i32 : i32, i32
  }
  func.func @transform_6(%arg0: i32, %arg1: i32) -> (i32, i32) {
    %c0_i32 = arith.constant 0 : i32
    %c0_i32_0 = arith.constant 0 : i32
    return %arg0, %c0_i32 : i32, i32
  }
}

</mosaic_0001>

<bundles_post_ra>
// kernel: tagconv_forward.3
= control target key start
LH: loop header
LB: loop body
LE: loop exit
PB: predicated region body
PF: predicated region fallthrough
CT: control target
= control target key end

     0   :  { %v886_v0 = vmov 1.0|1.0   ;;  %v887_v57 = vmov 0   ;;  %vm300_vm0 = vcmask 7168   ;;  %s1312_s0 = inlined_call_operand.vmem [shape: f32[128,128], index: 0, kind: input, shape index: {}]   ;;  %s1313_s2 = inlined_call_operand.vmem [shape: f32[128,128], index: 2, kind: input, shape index: {}]   ;;  %s1314_s1 = inlined_call_operand.vmem [shape: f32[128,128], index: 1, kind: input, shape index: {}]   ;;  %s1315_s5 = inlined_call_operand.vmem [shape: f32[128,1], index: 5, kind: output, shape index: {1}]   ;;  %s1316_s3 = inlined_call_operand.vmem [shape: f32[1,128], index: 3, kind: input, shape index: {}]   ;;  %s1317_s6 = inlined_call_operand.vmem [shape: f32[128,128], index: 6, kind: output, shape index: {2}]   ;;  %s1318_s4 = inlined_call_operand.vmem [shape: f32[128,128], index: 4, kind: output, shape index: {0}]  }
   0x1   :  { %802 = vmatprep.subr.bf16.mxu0 %v886_v0  ;;  %v56_v1 = vld [vmem:[%s1312_s0] sm:$0xff]  ;;  %v430_v3 = vld [vmem:[%s1313_s2 + $0x8] sm:$0xff]  ;;  %v431_v5 = vld [vmem:[%s1313_s2 + $0x10] sm:$0xff]  ;;  %852 = vset.pattern.permute.xlu0 %v887_v57 }
   0x2   :  { %803 = vmatpush3.bf16.msra.mxu0 %v886_v0  ;;  %722 = vmatprep.mubr.f32.mxu0 %v56_v1  ;;  %v429_v2 = vld [vmem:[%s1313_s2] sm:$0xff]  ;;  %v432_v6 = vld [vmem:[%s1313_s2 + $0x18] sm:$0xff]  ;;  %v434_v9 = vld [vmem:[%s1313_s2 + $0x28] sm:$0xff] }
   0x3   :  { %804 = vmatprep.subr.bf16.mxu0 %v886_v0  ;;  %v818_v4 = vpack.c.bf16 %v430_v3, %v429_v2  ;;  %v822_v7 = vpack.c.bf16 %v432_v6, %v431_v5  ;;  %v433_v8 = vld [vmem:[%s1313_s2 + $0x20] sm:$0xff]  ;;  %v435_v12 = vld [vmem:[%s1313_s2 + $0x30] sm:$0xff]  ;;  %v436_v13 = vld [vmem:[%s1313_s2 + $0x38] sm:$0xff]  ;;  %853 = vset.pattern.permute.xlu1 %v887_v57 }
   0x4   :  { %v826_v10 = vpack.c.bf16 %v434_v9, %v433_v8  ;;  %v947_v11 = vld [vmem:[%s1314_s1] sm:$0xff]  ;;  %v830_v14 = vpack.c.bf16 %v436_v13, %v435_v12  ;;  %v438_v16 = vld [vmem:[%s1313_s2 + $0x48] sm:$0xff]  ;;  %v439_v18 = vld [vmem:[%s1313_s2 + $0x50] sm:$0xff] }
   0x5   :  { %819 = vmatprep.subr.bf16.mxu1 %v818_v4  ;;  %778 = vmatprep.mubr.f32.mxu1 %v947_v11  ;;  %v437_v15 = vld [vmem:[%s1313_s2 + $0x40] sm:$0xff]  ;;  %v440_v19 = vld [vmem:[%s1313_s2 + $0x58] sm:$0xff]  ;;  %v442_v22 = vld [vmem:[%s1313_s2 + $0x68] sm:$0xff] }
   0x6   :  { %805 = vmatpush3.bf16.msra.mxu0 %v886_v0  ;;  %821 = vmatpush3.bf16.msra.mxu1 %v818_v4  ;;  %v834_v17 = vpack.c.bf16 %v438_v16, %v437_v15  ;;  %v838_v20 = vpack.c.bf16 %v440_v19, %v439_v18  ;;  %v441_v21 = vld [vmem:[%s1313_s2 + $0x60] sm:$0xff]  ;;  %v443_v24 = vld [vmem:[%s1313_s2 + $0x70] sm:$0xff]  ;;  %v444_v25 = vld [vmem:[%s1313_s2 + $0x78] sm:$0xff] }
   0x7   :  { %806 = vmatprep.subr.bf16.mxu0 %v886_v0  ;;  %823 = vmatprep.subr.bf16.mxu1 %v822_v7  ;;  %v842_v23 = vpack.c.bf16 %v442_v22, %v441_v21  ;;  %v57_v26 = vld [vmem:[%s1312_s0 + $0x8] sm:$0xff]  ;;  %v58_v27 = vld [vmem:[%s1312_s0 + $0x10] sm:$0xff]  ;;  %v846_v28 = vpack.c.bf16 %v444_v25, %v443_v24  ;;  %v59_v29 = vld [vmem:[%s1312_s0 + $0x18] sm:$0xff] }
   0x8   :  { %v60_v30 = vld [vmem:[%s1312_s0 + $0x20] sm:$0xff]  ;;  %v61_v31 = vld [vmem:[%s1312_s0 + $0x28] sm:$0xff]  ;;  %v62_v33 = vld [vmem:[%s1312_s0 + $0x30] sm:$0xff] }
   0x9   :  { %v998_v32 = vld [vmem:[%s1314_s1 + $0x8] sm:$0xff]  ;;  %v1006_v34 = vld [vmem:[%s1314_s1 + $0x10] sm:$0xff]  ;;  %v63_v35 = vld [vmem:[%s1312_s0 + $0x38] sm:$0xff] }
   0xa   :  { %807 = vmatpush3.bf16.msra.mxu0 %v886_v0  ;;  %825 = vmatpush3.bf16.msra.mxu1 %v822_v7  ;;  %v1016_v36 = vld [vmem:[%s1314_s1 + $0x18] sm:$0xff]  ;;  %v64_v37 = vld [vmem:[%s1312_s0 + $0x40] sm:$0xff]  ;;  %v65_v39 = vld [vmem:[%s1312_s0 + $0x48] sm:$0xff] }
   0xb   :  { %808 = vmatprep.subr.bf16.mxu0 %v886_v0  ;;  %827 = vmatprep.subr.bf16.mxu1 %v826_v10  ;;  %v1024_v38 = vld [vmem:[%s1314_s1 + $0x20] sm:$0xff]  ;;  %v1034_v40 = vld [vmem:[%s1314_s1 + $0x28] sm:$0xff]  ;;  %v66_v41 = vld [vmem:[%s1312_s0 + $0x50] sm:$0xff] }
   0xc   :  { %v1042_v42 = vld [vmem:[%s1314_s1 + $0x30] sm:$0xff]  ;;  %v67_v43 = vld [vmem:[%s1312_s0 + $0x58] sm:$0xff]  ;;  %v68_v45 = vld [vmem:[%s1312_s0 + $0x60] sm:$0xff] }
   0xd   :  { %v1052_v44 = vld [vmem:[%s1314_s1 + $0x38] sm:$0xff]  ;;  %v1060_v46 = vld [vmem:[%s1314_s1 + $0x40] sm:$0xff]  ;;  %v69_v47 = vld [vmem:[%s1312_s0 + $0x68] sm:$0xff] }
   0xe   :  { %809 = vmatpush3.bf16.msra.mxu0 %v886_v0  ;;  %829 = vmatpush3.bf16.msra.mxu1 %v826_v10  ;;  %v1070_v48 = vld [vmem:[%s1314_s1 + $0x48] sm:$0xff]  ;;  %v70_v49 = vld [vmem:[%s1312_s0 + $0x70] sm:$0xff]  ;;  %v71_v51 = vld [vmem:[%s1312_s0 + $0x78] sm:$0xff] }
   0xf   :  { %810 = vmatprep.subr.bf16.mxu0 %v886_v0  ;;  %831 = vmatprep.subr.bf16.mxu1 %v830_v14  ;;  %v1078_v50 = vld [vmem:[%s1314_s1 + $0x50] sm:$0xff]  ;;  %v1088_v52 = vld [vmem:[%s1314_s1 + $0x58] sm:$0xff]  ;;  %v1093_v53 = vld [vmem:[%s1314_s1 + $0x60] sm:$0xff] }
  0x10   :  { %v1100_v54 = vld [vmem:[%s1314_s1 + $0x68] sm:$0xff]  ;;  %v1105_v55 = vld [vmem:[%s1314_s1 + $0x70] sm:$0xff]  ;;  %v1112_v56 = vld [vmem:[%s1314_s1 + $0x78] sm:$0xff] }
  0x11   :  { %v1126_v5 = vld [vmem:[%s1316_s3] ss:$0 sm:$0xff] }
  0x12   :  { %811 = vmatpush3.bf16.msra.mxu0 %v886_v0  ;;  %833 = vmatpush3.bf16.msra.mxu1 %v830_v14 }
  0x13   :  { %812 = vmatprep.subr.bf16.mxu0 %v886_v0  ;;  %835 = vmatprep.subr.bf16.mxu1 %v834_v17 }
  0x16   :  { %813 = vmatpush3.bf16.msra.mxu0 %v886_v0  ;;  %837 = vmatpush3.bf16.msra.mxu1 %v834_v17 }
  0x17   :  { %814 = vmatprep.subr.bf16.mxu0 %v886_v0  ;;  %839 = vmatprep.subr.bf16.mxu1 %v838_v20 }
  0x1a   :  { %815 = vmatpush3.bf16.msra.mxu0 %v886_v0  ;;  %841 = vmatpush3.bf16.msra.mxu1 %v838_v20 }
  0x1b   :  { %816 = vmatprep.subr.bf16.mxu0 %v886_v0  ;;  %843 = vmatprep.subr.bf16.mxu1 %v842_v23 }
  0x1e   :  { %817 = vmatpush3.bf16.msra.mxu0 %v886_v0  ;;  %845 = vmatpush3.bf16.msra.mxu1 %v842_v23 }
  0x1f   :  { %847 = vmatprep.subr.bf16.mxu1 %v846_v28 }
  0x21   :  { %723 = vmatmul.mubr.f32.vlgmr.msra.gmra.mrb[0].mxu0 %v57_v26 }
  0x22   :  { %725 = vmatprep.mubr.f32.mxu0 %v58_v27  ;;  %849 = vmatpush3.bf16.msra.mxu1 %v846_v28 }
  0x25   :  { %726 = vmatmul.mubr.f32.gmra.mrb[2].mxu0 %v59_v29  ;;  %779 = vmatmul.mubr.f32.vlgmr.msra.gmra.mrb[0].mxu1 %v998_v32 }
  0x26   :  { %728 = vmatprep.mubr.f32.mxu0 %v60_v30  ;;  %781 = vmatprep.mubr.f32.mxu1 %v1006_v34 }
  0x29   :  { %729 = vmatmul.mubr.f32.gmra.mrb[4].mxu0 %v61_v31  ;;  %782 = vmatmul.mubr.f32.gmra.mrb[2].mxu1 %v1016_v36 }
  0x2a   :  { %731 = vmatprep.mubr.f32.mxu0 %v62_v33  ;;  %784 = vmatprep.mubr.f32.mxu1 %v1024_v38 }
  0x2d   :  { %732 = vmatmul.mubr.f32.gmra.mrb[6].mxu0 %v63_v35  ;;  %785 = vmatmul.mubr.f32.gmra.mrb[4].mxu1 %v1034_v40 }
  0x2e   :  { %734 = vmatprep.mubr.f32.mxu0 %v64_v37  ;;  %787 = vmatprep.mubr.f32.mxu1 %v1042_v42 }
  0x31   :  { %735 = vmatmul.mubr.f32.gmra.mrb[8].mxu0 %v65_v39  ;;  %788 = vmatmul.mubr.f32.gmra.mrb[6].mxu1 %v1052_v44 }
  0x32   :  { %737 = vmatprep.mubr.f32.mxu0 %v66_v41  ;;  %790 = vmatprep.mubr.f32.mxu1 %v1060_v46 }
  0x35   :  { %738 = vmatmul.mubr.f32.gmra.mrb[10].mxu0 %v67_v43  ;;  %791 = vmatmul.mubr.f32.gmra.mrb[8].mxu1 %v1070_v48 }
  0x36   :  { %740 = vmatprep.mubr.f32.mxu0 %v68_v45  ;;  %793 = vmatprep.mubr.f32.mxu1 %v1078_v50 }
  0x39   :  { %741 = vmatmul.mubr.f32.gmra.mrb[12].mxu0 %v69_v47  ;;  %794 = vmatmul.mubr.f32.gmra.mrb[10].mxu1 %v1088_v52 }
  0x3a   :  { %743 = vmatprep.mubr.f32.mxu0 %v70_v49  ;;  %796 = vmatprep.mubr.f32.mxu1 %v1093_v53 }
  0x3d   :  { %744 = vmatmul.mubr.f32.gmra.mrb[14].mxu0 %v71_v51  ;;  %797 = vmatmul.mubr.f32.gmra.mrb[12].mxu1 %v1100_v54 }
  0x3e   :  { %799 = vmatprep.mubr.f32.mxu1 %v1105_v55 }
  0x41   :  { %800 = vmatmul.mubr.f32.gmra.mrb[14].mxu1 %v1112_v56 }
  0xf4   :  { %v724_v58 = vpop.f32.mrb[0].mxu0 }
  0xf5   :  { %854 = vrsqrt.f32 %v724_v58  ;;  %v138_v59 = vpop.f32.mrb[1].mxu0 }
  0xf6   :  { %856 = vrsqrt.f32 %v138_v59 }
  0xf8   :  { %v727_v60 = vpop.f32.mrb[2].mxu0  ;;  %v780_v4 = vpop.f32.mrb[0].mxu1 }
  0xf9   :  { %858 = vrsqrt.f32 %v727_v60  ;;  %v148_v61 = vpop.f32.mrb[3].mxu0  ;;  %v518_v6 = vpop.f32.mrb[1].mxu1  ;;  %v524_v8 = vadd.f32 %v780_v4, %v1126_v5 }
  0xfa   :  { %860 = vrsqrt.f32 %v148_v61  ;;  %v519_v9 = vadd.f32 %v1126_v5, %v518_v6 }
  0xfb   :  { %598 = vst [vmem:[%s1317_s6 + $0x8] sm:$0xff] %v524_v8 }
  0xfc   :  { %v730_v62 = vpop.f32.mrb[4].mxu0  ;;  %597 = vst [vmem:[%s1317_s6] sm:$0xff] %v519_v9  ;;  %v783_v14 = vpop.f32.mrb[2].mxu1 }
  0xfd   :  { %862 = vrsqrt.f32 %v730_v62  ;;  %v158_v63 = vpop.f32.mrb[5].mxu0  ;;  %v534_v15 = vadd.f32 %v783_v14, %v1126_v5  ;;  %v528_v16 = vpop.f32.mrb[3].mxu1 }
  0xfe   :  { %864 = vrsqrt.f32 %v158_v63  ;;  %v529_v18 = vadd.f32 %v1126_v5, %v528_v16 }
  0xff   :  { %v855_v0 = vpop.eup %854  ;;  %600 = vst [vmem:[%s1317_s6 + $0x18] sm:$0xff] %v534_v15 }
 0x100   :  { %v857_v1 = vpop.eup %856  ;;  %302 = vst.msk [vmem:[%s1315_s5 + $0x8] sm:$0xff] %vm300_vm0, %v855_v0  ;;  %324 = vperm.xlu0 %852, %v855_v0   ;;  %v733_v2 = vpop.f32.mrb[6].mxu0  ;;  %599 = vst [vmem:[%s1317_s6 + $0x10] sm:$0xff] %v529_v18 }
 0x101   :  { %301 = vst.msk [vmem:[%s1315_s5] sm:$0xff] %vm300_vm0, %v857_v1  ;;  %866 = vrsqrt.f32 %v733_v2  ;;  %v168_v3 = vpop.f32.mrb[7].mxu0  ;;  %v786_v22 = vpop.f32.mrb[4].mxu1 }
 0x102   :  { %868 = vrsqrt.f32 %v168_v3  ;;  %v538_v23 = vpop.f32.mrb[5].mxu1  ;;  %v544_v25 = vadd.f32 %v786_v22, %v1126_v5 }
 0x103   :  { %v859_v7 = vpop.eup %858  ;;  %v539_v26 = vadd.f32 %v1126_v5, %v538_v23 }
 0x104   :  { %v861_v10 = vpop.eup %860  ;;  %304 = vst.msk [vmem:[%s1315_s5 + $0x18] sm:$0xff] %vm300_vm0, %v859_v7  ;;  %319 = vperm.xlu0 %852, %v857_v1   ;;  %334 = vperm.xlu1 %853, %v859_v7   ;;  %v736_v12 = vpop.f32.mrb[8].mxu0  ;;  %602 = vst [vmem:[%s1317_s6 + $0x28] sm:$0xff] %v544_v25 }
 0x105   :  { %303 = vst.msk [vmem:[%s1315_s5 + $0x10] sm:$0xff] %vm300_vm0, %v861_v10  ;;  %870 = vrsqrt.f32 %v736_v12  ;;  %v178_v13 = vpop.f32.mrb[9].mxu0  ;;  %601 = vst [vmem:[%s1317_s6 + $0x20] sm:$0xff] %v539_v26  ;;  %v789_v30 = vpop.f32.mrb[6].mxu1 }
 0x106   :  { %872 = vrsqrt.f32 %v178_v13  ;;  %v548_v31 = vpop.f32.mrb[7].mxu1  ;;  %v554_v35 = vadd.f32 %v789_v30, %v1126_v5 }
 0x107   :  { %v863_v17 = vpop.eup %862  ;;  %v549_v37 = vadd.f32 %v1126_v5, %v548_v31 }
 0x108   :  { %v865_v19 = vpop.eup %864  ;;  %306 = vst.msk [vmem:[%s1315_s5 + $0x28] sm:$0xff] %vm300_vm0, %v863_v17  ;;  %329 = vperm.xlu1 %853, %v861_v10   ;;  %v739_v20 = vpop.f32.mrb[10].mxu0  ;;  %604 = vst [vmem:[%s1317_s6 + $0x38] sm:$0xff] %v554_v35 }
 0x109   :  { %305 = vst.msk [vmem:[%s1315_s5 + $0x20] sm:$0xff] %vm300_vm0, %v865_v19  ;;  %874 = vrsqrt.f32 %v739_v20  ;;  %339 = vperm.xlu0 %852, %v865_v19   ;;  %v188_v21 = vpop.f32.mrb[11].mxu0  ;;  %603 = vst [vmem:[%s1317_s6 + $0x30] sm:$0xff] %v549_v37  ;;  %v792_v45 = vpop.f32.mrb[8].mxu1 }
 0x10a   :  { %876 = vrsqrt.f32 %v188_v21  ;;  %v558_v47 = vpop.f32.mrb[9].mxu1  ;;  %v564_v51 = vadd.f32 %v792_v45, %v1126_v5 }
 0x10b   :  { %v867_v24 = vpop.eup %866  ;;  %v559_v57 = vadd.f32 %v1126_v5, %v558_v47 }
 0x10c   :  { %v869_v27 = vpop.eup %868  ;;  %308 = vst.msk [vmem:[%s1315_s5 + $0x38] sm:$0xff] %vm300_vm0, %v867_v24  ;;  %344 = vperm.xlu1 %853, %v863_v17   ;;  %v742_v28 = vpop.f32.mrb[12].mxu0  ;;  %606 = vst [vmem:[%s1317_s6 + $0x48] sm:$0xff] %v564_v51 }
 0x10d   :  { %307 = vst.msk [vmem:[%s1315_s5 + $0x30] sm:$0xff] %vm300_vm0, %v869_v27  ;;  %878 = vrsqrt.f32 %v742_v28  ;;  %349 = vperm.xlu0 %852, %v869_v27   ;;  %v198_v29 = vpop.f32.mrb[13].mxu0  ;;  %605 = vst [vmem:[%s1317_s6 + $0x40] sm:$0xff] %v559_v57  ;;  %v795_v59 = vpop.f32.mrb[10].mxu1 }
 0x10e   :  { %880 = vrsqrt.f32 %v198_v29  ;;  %v568_v60 = vpop.f32.mrb[11].mxu1  ;;  %v574_v62 = vadd.f32 %v795_v59, %v1126_v5 }
 0x10f   :  { %v871_v33 = vpop.eup %870  ;;  %v569_v63 = vadd.f32 %v1126_v5, %v568_v60 }
 0x110   :  { %v873_v39 = vpop.eup %872  ;;  %310 = vst.msk [vmem:[%s1315_s5 + $0x48] sm:$0xff] %vm300_vm0, %v871_v33  ;;  %354 = vperm.xlu1 %853, %v867_v24   ;;  %v745_v41 = vpop.f32.mrb[14].mxu0  ;;  %608 = vst [vmem:[%s1317_s6 + $0x58] sm:$0xff] %v574_v62 }
 0x111   :  { %309 = vst.msk [vmem:[%s1315_s5 + $0x40] sm:$0xff] %vm300_vm0, %v873_v39  ;;  %882 = vrsqrt.f32 %v745_v41  ;;  %359 = vperm.xlu0 %852, %v873_v39   ;;  %v208_v43 = vpop.f32.mrb[15].mxu0  ;;  %607 = vst [vmem:[%s1317_s6 + $0x50] sm:$0xff] %v569_v63  ;;  %v798_v1 = vpop.f32.mrb[12].mxu1 }
 0x112   :  { %884 = vrsqrt.f32 %v208_v43  ;;  %v578_v2 = vpop.f32.mrb[13].mxu1  ;;  %v584_v4 = vadd.f32 %v798_v1, %v1126_v5 }
 0x113   :  { %v875_v49 = vpop.eup %874  ;;  %v579_v6 = vadd.f32 %v1126_v5, %v578_v2 }
 0x114   :  { %v877_v58 = vpop.eup %876  ;;  %312 = vst.msk [vmem:[%s1315_s5 + $0x58] sm:$0xff] %vm300_vm0, %v875_v49  ;;  %364 = vperm.xlu1 %853, %v871_v33   ;;  %610 = vst [vmem:[%s1317_s6 + $0x68] sm:$0xff] %v584_v4  ;;  %v801_v8 = vpop.f32.mrb[14].mxu1 }
 0x115   :  { %311 = vst.msk [vmem:[%s1315_s5 + $0x50] sm:$0xff] %vm300_vm0, %v877_v58  ;;  %369 = vperm.xlu0 %852, %v877_v58   ;;  %609 = vst [vmem:[%s1317_s6 + $0x60] sm:$0xff] %v579_v6  ;;  %v588_v9 = vpop.f32.mrb[15].mxu1  ;;  %v594_v10 = vadd.f32 %v801_v8, %v1126_v5 }
 0x116   :  { %v589_v12 = vadd.f32 %v1126_v5, %v588_v9 }
 0x117   :  { %v879_v61 = vpop.eup %878  ;;  %612 = vst [vmem:[%s1317_s6 + $0x78] sm:$0xff] %v594_v10 }
 0x118   :  { %v881_v0 = vpop.eup %880  ;;  %314 = vst.msk [vmem:[%s1315_s5 + $0x68] sm:$0xff] %vm300_vm0, %v879_v61  ;;  %374 = vperm.xlu1 %853, %v875_v49   ;;  %611 = vst [vmem:[%s1317_s6 + $0x70] sm:$0xff] %v589_v12 }
 0x119   :  { %313 = vst.msk [vmem:[%s1315_s5 + $0x60] sm:$0xff] %vm300_vm0, %v881_v0  ;;  %379 = vperm.xlu0 %852, %v881_v0  }
 0x11b   :  { %v883_v3 = vpop.eup %882 }
 0x11c   :  { %v885_v7 = vpop.eup %884  ;;  %316 = vst.msk [vmem:[%s1315_s5 + $0x78] sm:$0xff] %vm300_vm0, %v883_v3  ;;  %384 = vperm.xlu1 %853, %v879_v61  }
 0x11d   :  { %315 = vst.msk [vmem:[%s1315_s5 + $0x70] sm:$0xff] %vm300_vm0, %v885_v7  ;;  %389 = vperm.xlu0 %852, %v885_v7  }
 0x120   :  { %394 = vperm.xlu1 %853, %v883_v3  }
 0x17f   :  { %v325_v13 = vpop.permute.xlu0 %324 }
 0x180   :  { %v398_v14 = vmul.f32 %v325_v13, %v998_v32 }
 0x182   :  { %414 = vst [vmem:[%s1318_s4 + $0x8] sm:$0xff] %v398_v14 }
 0x183   :  { %v320_v15 = vpop.permute.xlu0 %319  ;;  %v335_v16 = vpop.permute.xlu1 %334 }
 0x184   :  { %v397_v5 = vmul.f32 %v320_v15, %v947_v11  ;;  %v400_v17 = vmul.f32 %v335_v16, %v1016_v36 }
 0x186   :  { %413 = vst [vmem:[%s1318_s4] sm:$0xff] %v397_v5  ;;  %416 = vst [vmem:[%s1318_s4 + $0x18] sm:$0xff] %v400_v17 }
 0x187   :  { %v330_v18 = vpop.permute.xlu1 %329 }
 0x188   :  { %v399_v32 = vmul.f32 %v330_v18, %v1006_v34  ;;  %v340_v19 = vpop.permute.xlu0 %339 }
 0x189   :  { %v401_v20 = vmul.f32 %v340_v19, %v1024_v38 }
 0x18a   :  { %415 = vst [vmem:[%s1318_s4 + $0x10] sm:$0xff] %v399_v32 }
 0x18b   :  { %417 = vst [vmem:[%s1318_s4 + $0x20] sm:$0xff] %v401_v20  ;;  %v345_v11 = vpop.permute.xlu1 %344 }
 0x18c   :  { %v402_v36 = vmul.f32 %v345_v11, %v1034_v40  ;;  %v350_v21 = vpop.permute.xlu0 %349 }
 0x18d   :  { %v403_v22 = vmul.f32 %v350_v21, %v1042_v42 }
 0x18e   :  { %418 = vst [vmem:[%s1318_s4 + $0x28] sm:$0xff] %v402_v36 }
 0x18f   :  { %419 = vst [vmem:[%s1318_s4 + $0x30] sm:$0xff] %v403_v22  ;;  %v355_v34 = vpop.permute.xlu1 %354 }
 0x190   :  { %v404_v38 = vmul.f32 %v355_v34, %v1052_v44  ;;  %v360_v23 = vpop.permute.xlu0 %359 }
 0x191   :  { %v405_v24 = vmul.f32 %v360_v23, %v1060_v46 }
 0x192   :  { %420 = vst [vmem:[%s1318_s4 + $0x38] sm:$0xff] %v404_v38 }
 0x193   :  { %421 = vst [vmem:[%s1318_s4 + $0x40] sm:$0xff] %v405_v24  ;;  %v365_v40 = vpop.permute.xlu1 %364 }
 0x194   :  { %v406_v42 = vmul.f32 %v365_v40, %v1070_v48  ;;  %v370_v25 = vpop.permute.xlu0 %369 }
 0x195   :  { %v407_v26 = vmul.f32 %v370_v25, %v1078_v50 }
 0x196   :  { %422 = vst [vmem:[%s1318_s4 + $0x48] sm:$0xff] %v406_v42 }
 0x197   :  { %423 = vst [vmem:[%s1318_s4 + $0x50] sm:$0xff] %v407_v26  ;;  %v375_v44 = vpop.permute.xlu1 %374 }
 0x198   :  { %v408_v46 = vmul.f32 %v375_v44, %v1088_v52  ;;  %v380_v27 = vpop.permute.xlu0 %379 }
 0x199   :  { %v409_v28 = vmul.f32 %v380_v27, %v1093_v53 }
 0x19a   :  { %424 = vst [vmem:[%s1318_s4 + $0x58] sm:$0xff] %v408_v46 }
 0x19b   :  { %425 = vst [vmem:[%s1318_s4 + $0x60] sm:$0xff] %v409_v28  ;;  %v385_v48 = vpop.permute.xlu1 %384 }
 0x19c   :  { %v410_v50 = vmul.f32 %v385_v48, %v1100_v54  ;;  %v390_v29 = vpop.permute.xlu0 %389 }
 0x19d   :  { %v411_v30 = vmul.f32 %v390_v29, %v1105_v55 }
 0x19e   :  { %426 = vst [vmem:[%s1318_s4 + $0x68] sm:$0xff] %v410_v50 }
 0x19f   :  { %427 = vst [vmem:[%s1318_s4 + $0x70] sm:$0xff] %v411_v30  ;;  %v395_v52 = vpop.permute.xlu1 %394 }
 0x1a0   :  { %v412_v53 = vmul.f32 %v395_v52, %v1112_v56 }
 0x1a2   :  { %428 = vst [vmem:[%s1318_s4 + $0x78] sm:$0xff] %v412_v53 }

// kernel: tagconv_forward.4
= control target key start
LH: loop header
LB: loop body
LE: loop exit
PB: predicated region body
PF: predicated region fallthrough
CT: control target
= control target key end

     0   :  { %v890_v3 = vmov 0   ;;  %s1262_s1 = inlined_call_operand.vmem [shape: f32[128,128], index: 1, kind: input, shape index: {}]   ;;  %s1263_s0 = inlined_call_operand.vmem [shape: f32[128,128], index: 0, kind: input, shape index: {}]   ;;  %s1264_s2 = inlined_call_operand.vmem [shape: f32[128,1], index: 2, kind: input, shape index: {}]   ;;  %s1265_s3 = inlined_call_operand.vmem [shape: f32[128,128], index: 3, kind: input, shape index: {}]   ;;  %s1266_s5 = inlined_call_operand.vmem [shape: f32[128,128], index: 5, kind: output, shape index: {0}]   ;;  %s1267_s4 = inlined_call_operand.vmem [shape: f32[128,128], index: 4, kind: input, shape index: {}, may-alias: {4,6}]   ;;  %s1268_s6 = inlined_call_operand.vmem [shape: f32[128,128], index: 6, kind: output, shape index: {1}, may-alias: {4,6}]  }
   0x1   :  { %v74_v0 = vld [vmem:[%s1262_s1] sm:$0xff]  ;;  %v75_v1 = vld [vmem:[%s1262_s1 + $0x8] sm:$0xff]  ;;  %v76_v2 = vld [vmem:[%s1262_s1 + $0x10] sm:$0xff]  ;;  %888 = vset.pattern.permute.xlu0 %v890_v3  ;;  %889 = vset.pattern.permute.xlu1 %v890_v3 }
   0x2   :  { %v823_v4 = vpack.c.bf16 %v75_v1, %v74_v0  ;;  %v77_v5 = vld [vmem:[%s1262_s1 + $0x18] sm:$0xff]  ;;  %v78_v7 = vld [vmem:[%s1262_s1 + $0x20] sm:$0xff]  ;;  %v79_v8 = vld [vmem:[%s1262_s1 + $0x28] sm:$0xff] }
   0x3   :  { %v827_v6 = vpack.c.bf16 %v77_v5, %v76_v2  ;;  %v831_v9 = vpack.c.bf16 %v79_v8, %v78_v7  ;;  %v58_v10 = vld [vmem:[%s1263_s0] sm:$0xff]  ;;  %v80_v11 = vld [vmem:[%s1262_s1 + $0x30] sm:$0xff]  ;;  %v81_v12 = vld [vmem:[%s1262_s1 + $0x38] sm:$0xff] }
   0x4   :  { %824 = vmatprep.subr.bf16.mxu0 %v823_v4  ;;  %743 = vmatprep.mubr.f32.mxu0 %v58_v10  ;;  %v835_v13 = vpack.c.bf16 %v81_v12, %v80_v11  ;;  %v82_v14 = vld [vmem:[%s1262_s1 + $0x40] sm:$0xff]  ;;  %v83_v15 = vld [vmem:[%s1262_s1 + $0x48] sm:$0xff]  ;;  %v272_v17 = vld [vmem:[%s1264_s2 + $0x10] sm:$0xff] }
   0x5   :  { %826 = vmatpush3.bf16.msra.mxu0 %v823_v4  ;;  %v270_v16 = vld [vmem:[%s1264_s2] sm:$0xff]  ;;  %314 = vperm.xlu1 %889, %v272_v17   ;;  %v271_v18 = vld [vmem:[%s1264_s2 + $0x8] sm:$0xff]  ;;  %v839_v19 = vpack.c.bf16 %v83_v15, %v82_v14  ;;  %v273_v20 = vld [vmem:[%s1264_s2 + $0x18] sm:$0xff] }
   0x6   :  { %828 = vmatprep.subr.bf16.mxu0 %v827_v6  ;;  %304 = vperm.xlu0 %888, %v270_v16   ;;  %v84_v21 = vld [vmem:[%s1262_s1 + $0x50] sm:$0xff]  ;;  %v85_v22 = vld [vmem:[%s1262_s1 + $0x58] sm:$0xff]  ;;  %v274_v23 = vld [vmem:[%s1264_s2 + $0x20] sm:$0xff] }
   0x7   :  { %v446_v24 = vld [vmem:[%s1265_s3] sm:$0xff]  ;;  %v447_v25 = vld [vmem:[%s1265_s3 + $0x8] sm:$0xff]  ;;  %v448_v26 = vld [vmem:[%s1265_s3 + $0x10] sm:$0xff]  ;;  %v843_v27 = vpack.c.bf16 %v85_v22, %v84_v21 }
   0x8   :  { %v275_v28 = vld [vmem:[%s1264_s2 + $0x28] sm:$0xff]  ;;  %v855_v29 = vpack.c.bf16 %v447_v25, %v446_v24  ;;  %v449_v30 = vld [vmem:[%s1265_s3 + $0x18] sm:$0xff]  ;;  %v86_v31 = vld [vmem:[%s1262_s1 + $0x60] sm:$0xff] }
   0x9   :  { %830 = vmatpush3.bf16.msra.mxu0 %v827_v6  ;;  %319 = vperm.xlu1 %889, %v273_v20   ;;  %v87_v32 = vld [vmem:[%s1262_s1 + $0x68] sm:$0xff]  ;;  %v859_v33 = vpack.c.bf16 %v449_v30, %v448_v26  ;;  %v450_v34 = vld [vmem:[%s1265_s3 + $0x20] sm:$0xff]  ;;  %v276_v36 = vld [vmem:[%s1264_s2 + $0x30] sm:$0xff] }
   0xa   :  { %832 = vmatprep.subr.bf16.mxu0 %v831_v9  ;;  %309 = vperm.xlu0 %888, %v271_v18   ;;  %v451_v35 = vld [vmem:[%s1265_s3 + $0x28] sm:$0xff]  ;;  %v847_v37 = vpack.c.bf16 %v87_v32, %v86_v31  ;;  %v277_v38 = vld [vmem:[%s1264_s2 + $0x38] sm:$0xff]  ;;  %v88_v39 = vld [vmem:[%s1262_s1 + $0x70] sm:$0xff] }
   0xb   :  { %856 = vmatprep.subr.bf16.mxu1 %v855_v29  ;;  %v89_v40 = vld [vmem:[%s1262_s1 + $0x78] sm:$0xff]  ;;  %v863_v41 = vpack.c.bf16 %v451_v35, %v450_v34  ;;  %v452_v42 = vld [vmem:[%s1265_s3 + $0x30] sm:$0xff]  ;;  %v278_v44 = vld [vmem:[%s1264_s2 + $0x40] sm:$0xff] }
   0xc   :  { %858 = vmatpush3.bf16.msra.mxu1 %v855_v29  ;;  %v453_v43 = vld [vmem:[%s1265_s3 + $0x38] sm:$0xff]  ;;  %v851_v45 = vpack.c.bf16 %v89_v40, %v88_v39  ;;  %v279_v46 = vld [vmem:[%s1264_s2 + $0x48] sm:$0xff]  ;;  %v454_v48 = vld [vmem:[%s1265_s3 + $0x40] sm:$0xff] }
   0xd   :  { %834 = vmatpush3.bf16.msra.mxu0 %v831_v9  ;;  %329 = vperm.xlu1 %889, %v275_v28   ;;  %v867_v47 = vpack.c.bf16 %v453_v43, %v452_v42  ;;  %v455_v49 = vld [vmem:[%s1265_s3 + $0x48] sm:$0xff]  ;;  %v280_v50 = vld [vmem:[%s1264_s2 + $0x50] sm:$0xff]  ;;  %v281_v51 = vld [vmem:[%s1264_s2 + $0x58] sm:$0xff] }
   0xe   :  { %836 = vmatprep.subr.bf16.mxu0 %v835_v13  ;;  %324 = vperm.xlu0 %888, %v274_v23   ;;  %v871_v52 = vpack.c.bf16 %v455_v49, %v454_v48  ;;  %v456_v53 = vld [vmem:[%s1265_s3 + $0x50] sm:$0xff]  ;;  %v457_v54 = vld [vmem:[%s1265_s3 + $0x58] sm:$0xff]  ;;  %v59_v55 = vld [vmem:[%s1263_s0 + $0x8] sm:$0xff] }
   0xf   :  { %860 = vmatprep.subr.bf16.mxu1 %v859_v33  ;;  %v282_v56 = vld [vmem:[%s1264_s2 + $0x60] sm:$0xff]  ;;  %v60_v57 = vld [vmem:[%s1263_s0 + $0x10] sm:$0xff]  ;;  %v283_v58 = vld [vmem:[%s1264_s2 + $0x68] sm:$0xff]  ;;  %v875_v59 = vpack.c.bf16 %v457_v54, %v456_v53 }
  0x10   :  { %862 = vmatpush3.bf16.msra.mxu1 %v859_v33  ;;  %v458_v60 = vld [vmem:[%s1265_s3 + $0x60] sm:$0xff]  ;;  %v459_v61 = vld [vmem:[%s1265_s3 + $0x68] sm:$0xff]  ;;  %v61_v62 = vld [vmem:[%s1263_s0 + $0x18] sm:$0xff] }
  0x11   :  { %838 = vmatpush3.bf16.msra.mxu0 %v835_v13  ;;  %339 = vperm.xlu1 %889, %v277_v38   ;;  %v284_v63 = vld [vmem:[%s1264_s2 + $0x70] sm:$0xff]  ;;  %v62_v0 = vld [vmem:[%s1263_s0 + $0x20] sm:$0xff]  ;;  %v285_v1 = vld [vmem:[%s1264_s2 + $0x78] sm:$0xff]  ;;  %v879_v2 = vpack.c.bf16 %v459_v61, %v458_v60 }
  0x12   :  { %840 = vmatprep.subr.bf16.mxu0 %v839_v19  ;;  %334 = vperm.xlu0 %888, %v276_v36   ;;  %v63_v3 = vld [vmem:[%s1263_s0 + $0x28] sm:$0xff]  ;;  %v64_v4 = vld [vmem:[%s1263_s0 + $0x30] sm:$0xff]  ;;  %v65_v5 = vld [vmem:[%s1263_s0 + $0x38] sm:$0xff] }
  0x13   :  { %864 = vmatprep.subr.bf16.mxu1 %v863_v41  ;;  %v66_v6 = vld [vmem:[%s1263_s0 + $0x40] sm:$0xff]  ;;  %v67_v7 = vld [vmem:[%s1263_s0 + $0x48] sm:$0xff]  ;;  %v68_v8 = vld [vmem:[%s1263_s0 + $0x50] sm:$0xff] }
  0x14   :  { %866 = vmatpush3.bf16.msra.mxu1 %v863_v41  ;;  %v69_v9 = vld [vmem:[%s1263_s0 + $0x58] sm:$0xff]  ;;  %v70_v10 = vld [vmem:[%s1263_s0 + $0x60] sm:$0xff]  ;;  %v71_v11 = vld [vmem:[%s1263_s0 + $0x68] sm:$0xff] }
  0x15   :  { %842 = vmatpush3.bf16.msra.mxu0 %v839_v19  ;;  %349 = vperm.xlu1 %889, %v279_v46   ;;  %v72_v12 = vld [vmem:[%s1263_s0 + $0x70] sm:$0xff]  ;;  %v73_v13 = vld [vmem:[%s1263_s0 + $0x78] sm:$0xff] }
  0x16   :  { %844 = vmatprep.subr.bf16.mxu0 %v843_v27  ;;  %344 = vperm.xlu0 %888, %v278_v44   ;;  %v460_v14 = vld [vmem:[%s1265_s3 + $0x70] sm:$0xff]  ;;  %v461_v15 = vld [vmem:[%s1265_s3 + $0x78] sm:$0xff] }
  0x17   :  { %868 = vmatprep.subr.bf16.mxu1 %v867_v47  ;;  %v883_v16 = vpack.c.bf16 %v461_v15, %v460_v14 }
  0x18   :  { %870 = vmatpush3.bf16.msra.mxu1 %v867_v47 }
  0x19   :  { %846 = vmatpush3.bf16.msra.mxu0 %v843_v27  ;;  %359 = vperm.xlu1 %889, %v281_v51  }
  0x1a   :  { %848 = vmatprep.subr.bf16.mxu0 %v847_v37  ;;  %354 = vperm.xlu0 %888, %v280_v50  }
  0x1b   :  { %872 = vmatprep.subr.bf16.mxu1 %v871_v52 }
  0x1c   :  { %874 = vmatpush3.bf16.msra.mxu1 %v871_v52 }
  0x1d   :  { %850 = vmatpush3.bf16.msra.mxu0 %v847_v37  ;;  %369 = vperm.xlu1 %889, %v283_v58  }
  0x1e   :  { %852 = vmatprep.subr.bf16.mxu0 %v851_v45  ;;  %364 = vperm.xlu0 %888, %v282_v56  }
  0x1f   :  { %876 = vmatprep.subr.bf16.mxu1 %v875_v59 }
  0x20   :  { %878 = vmatpush3.bf16.msra.mxu1 %v875_v59 }
  0x21   :  { %854 = vmatpush3.bf16.msra.mxu0 %v851_v45  ;;  %379 = vperm.xlu1 %889, %v285_v1  }
  0x22   :  { %374 = vperm.xlu0 %888, %v284_v63   ;;  %880 = vmatprep.subr.bf16.mxu1 %v879_v2 }
  0x24   :  { %744 = vmatmul.mubr.f32.vlgmr.msra.gmra.mrb[0].mxu0 %v59_v55  ;;  %882 = vmatpush3.bf16.msra.mxu1 %v879_v2 }
  0x25   :  { %746 = vmatprep.mubr.f32.mxu0 %v60_v57  ;;  %884 = vmatprep.subr.bf16.mxu1 %v883_v16 }
  0x28   :  { %747 = vmatmul.mubr.f32.gmra.mrb[2].mxu0 %v61_v62  ;;  %886 = vmatpush3.bf16.msra.mxu1 %v883_v16 }
  0x29   :  { %749 = vmatprep.mubr.f32.mxu0 %v62_v0 }
  0x2c   :  { %750 = vmatmul.mubr.f32.gmra.mrb[4].mxu0 %v63_v3 }
  0x2d   :  { %752 = vmatprep.mubr.f32.mxu0 %v64_v4 }
  0x30   :  { %753 = vmatmul.mubr.f32.gmra.mrb[6].mxu0 %v65_v5 }
  0x31   :  { %755 = vmatprep.mubr.f32.mxu0 %v66_v6 }
  0x34   :  { %756 = vmatmul.mubr.f32.gmra.mrb[8].mxu0 %v67_v7 }
  0x35   :  { %758 = vmatprep.mubr.f32.mxu0 %v68_v8 }
  0x38   :  { %759 = vmatmul.mubr.f32.gmra.mrb[10].mxu0 %v69_v9 }
  0x39   :  { %761 = vmatprep.mubr.f32.mxu0 %v70_v10 }
  0x3c   :  { %762 = vmatmul.mubr.f32.gmra.mrb[12].mxu0 %v71_v11 }
  0x3d   :  { %764 = vmatprep.mubr.f32.mxu0 %v72_v12 }
  0x40   :  { %765 = vmatmul.mubr.f32.gmra.mrb[14].mxu0 %v73_v13 }
  0x84   :  { %v315_v17 = vpop.permute.xlu1 %314 }
  0x85   :  { %v305_v18 = vpop.permute.xlu0 %304 }
  0x88   :  { %v320_v19 = vpop.permute.xlu1 %319 }
  0x89   :  { %v310_v20 = vpop.permute.xlu0 %309 }
  0x8c   :  { %v330_v21 = vpop.permute.xlu1 %329 }
  0x8d   :  { %v325_v22 = vpop.permute.xlu0 %324 }
  0x90   :  { %v340_v28 = vpop.permute.xlu1 %339 }
  0x91   :  { %v335_v31 = vpop.permute.xlu0 %334 }
  0x94   :  { %v350_v40 = vpop.permute.xlu1 %349 }
  0x95   :  { %v345_v42 = vpop.permute.xlu0 %344 }
  0x98   :  { %v360_v50 = vpop.permute.xlu1 %359 }
  0x99   :  { %v355_v53 = vpop.permute.xlu0 %354 }
  0x9c   :  { %v370_v62 = vpop.permute.xlu1 %369 }
  0x9d   :  { %v365_v0 = vpop.permute.xlu0 %364 }
  0xa0   :  { %v380_v8 = vpop.permute.xlu1 %379 }
  0xa1   :  { %v375_v11 = vpop.permute.xlu0 %374 }
  0xf7   :  { %v745_v23 = vpop.f32.mrb[0].mxu0 }
  0xf8   :  { %v383_v24 = vmul.f32 %v745_v23, %v310_v20  ;;  %v156_v25 = vpop.f32.mrb[1].mxu0  ;;  %v433_v23 = vld [vmem:[%s1267_s4 + $0x18] sm:$0xff] }
  0xf9   :  { %v382_v26 = vmul.f32 %v305_v18, %v156_v25 }
  0xfa   :  { %v399_v27 = vmul.f32 %v383_v24, %v310_v20 }
  0xfb   :  { %v398_v29 = vmul.f32 %v382_v26, %v305_v18  ;;  %v748_v30 = vpop.f32.mrb[2].mxu0  ;;  %799 = vmatprep.mubr.f32.mxu1 %v382_v26  ;;  %v430_v18 = vld [vmem:[%s1267_s4] sm:$0xff] }
  0xfc   :  { %415 = vst [vmem:[%s1266_s5 + $0x8] sm:$0xff] %v399_v27  ;;  %v385_v32 = vmul.f32 %v748_v30, %v320_v19  ;;  %v166_v33 = vpop.f32.mrb[3].mxu0  ;;  %800 = vmatmul.mubr.f32.vlgmr.msra.gmra.mrb[0].mxu1 %v383_v24 }
  0xfd   :  { %414 = vst [vmem:[%s1266_s5] sm:$0xff] %v398_v29  ;;  %v384_v34 = vmul.f32 %v315_v17, %v166_v33 }
  0xfe   :  { %v401_v35 = vmul.f32 %v385_v32, %v320_v19 }
  0xff   :  { %v400_v36 = vmul.f32 %v384_v34, %v315_v17  ;;  %v751_v37 = vpop.f32.mrb[4].mxu0  ;;  %802 = vmatprep.mubr.f32.mxu1 %v384_v34  ;;  %v431_v17 = vld [vmem:[%s1267_s4 + $0x8] sm:$0xff] }
 0x100   :  { %417 = vst [vmem:[%s1266_s5 + $0x18] sm:$0xff] %v401_v35  ;;  %v387_v38 = vmul.f32 %v751_v37, %v330_v21  ;;  %v176_v39 = vpop.f32.mrb[5].mxu0  ;;  %803 = vmatmul.mubr.f32.gmra.mrb[2].mxu1 %v385_v32 }
 0x101   :  { %416 = vst [vmem:[%s1266_s5 + $0x10] sm:$0xff] %v400_v36  ;;  %v386_v41 = vmul.f32 %v325_v22, %v176_v39 }
 0x102   :  { %v403_v43 = vmul.f32 %v387_v38, %v330_v21 }
 0x103   :  { %v402_v44 = vmul.f32 %v386_v41, %v325_v22  ;;  %v754_v45 = vpop.f32.mrb[6].mxu0  ;;  %805 = vmatprep.mubr.f32.mxu1 %v386_v41 }
 0x104   :  { %419 = vst [vmem:[%s1266_s5 + $0x28] sm:$0xff] %v403_v43  ;;  %v389_v46 = vmul.f32 %v754_v45, %v340_v28  ;;  %v186_v47 = vpop.f32.mrb[7].mxu0  ;;  %806 = vmatmul.mubr.f32.gmra.mrb[4].mxu1 %v387_v38 }
 0x105   :  { %418 = vst [vmem:[%s1266_s5 + $0x20] sm:$0xff] %v402_v44  ;;  %v388_v48 = vmul.f32 %v335_v31, %v186_v47 }
 0x106   :  { %v405_v49 = vmul.f32 %v389_v46, %v340_v28 }
 0x107   :  { %v404_v51 = vmul.f32 %v388_v48, %v335_v31  ;;  %v757_v52 = vpop.f32.mrb[8].mxu0  ;;  %808 = vmatprep.mubr.f32.mxu1 %v388_v48 }
 0x108   :  { %421 = vst [vmem:[%s1266_s5 + $0x38] sm:$0xff] %v405_v49  ;;  %v391_v54 = vmul.f32 %v757_v52, %v350_v40  ;;  %v196_v55 = vpop.f32.mrb[9].mxu0  ;;  %809 = vmatmul.mubr.f32.gmra.mrb[6].mxu1 %v389_v46 }
 0x109   :  { %420 = vst [vmem:[%s1266_s5 + $0x30] sm:$0xff] %v404_v51  ;;  %v390_v56 = vmul.f32 %v345_v42, %v196_v55 }
 0x10a   :  { %v407_v57 = vmul.f32 %v391_v54, %v350_v40 }
 0x10b   :  { %v406_v58 = vmul.f32 %v390_v56, %v345_v42  ;;  %v760_v59 = vpop.f32.mrb[10].mxu0  ;;  %811 = vmatprep.mubr.f32.mxu1 %v390_v56 }
 0x10c   :  { %423 = vst [vmem:[%s1266_s5 + $0x48] sm:$0xff] %v407_v57  ;;  %v393_v60 = vmul.f32 %v760_v59, %v360_v50  ;;  %v206_v61 = vpop.f32.mrb[11].mxu0  ;;  %812 = vmatmul.mubr.f32.gmra.mrb[8].mxu1 %v391_v54 }
 0x10d   :  { %422 = vst [vmem:[%s1266_s5 + $0x40] sm:$0xff] %v406_v58  ;;  %v392_v63 = vmul.f32 %v355_v53, %v206_v61 }
 0x10e   :  { %v409_v1 = vmul.f32 %v393_v60, %v360_v50 }
 0x10f   :  { %v408_v2 = vmul.f32 %v392_v63, %v355_v53  ;;  %v763_v3 = vpop.f32.mrb[12].mxu0  ;;  %814 = vmatprep.mubr.f32.mxu1 %v392_v63 }
 0x110   :  { %425 = vst [vmem:[%s1266_s5 + $0x58] sm:$0xff] %v409_v1  ;;  %v395_v4 = vmul.f32 %v763_v3, %v370_v62  ;;  %v216_v5 = vpop.f32.mrb[13].mxu0  ;;  %815 = vmatmul.mubr.f32.gmra.mrb[10].mxu1 %v393_v60 }
 0x111   :  { %424 = vst [vmem:[%s1266_s5 + $0x50] sm:$0xff] %v408_v2  ;;  %v394_v6 = vmul.f32 %v365_v0, %v216_v5 }
 0x112   :  { %v411_v7 = vmul.f32 %v395_v4, %v370_v62 }
 0x113   :  { %v410_v9 = vmul.f32 %v394_v6, %v365_v0  ;;  %v766_v10 = vpop.f32.mrb[14].mxu0  ;;  %817 = vmatprep.mubr.f32.mxu1 %v394_v6 }
 0x114   :  { %427 = vst [vmem:[%s1266_s5 + $0x68] sm:$0xff] %v411_v7  ;;  %v397_v12 = vmul.f32 %v766_v10, %v380_v8  ;;  %v226_v13 = vpop.f32.mrb[15].mxu0  ;;  %818 = vmatmul.mubr.f32.gmra.mrb[12].mxu1 %v395_v4 }
 0x115   :  { %426 = vst [vmem:[%s1266_s5 + $0x60] sm:$0xff] %v410_v9  ;;  %v396_v14 = vmul.f32 %v375_v11, %v226_v13 }
 0x116   :  { %v413_v15 = vmul.f32 %v397_v12, %v380_v8 }
 0x117   :  { %v412_v16 = vmul.f32 %v396_v14, %v375_v11  ;;  %820 = vmatprep.mubr.f32.mxu1 %v396_v14 }
 0x118   :  { %429 = vst [vmem:[%s1266_s5 + $0x78] sm:$0xff] %v413_v15  ;;  %821 = vmatmul.mubr.f32.gmra.mrb[14].mxu1 %v397_v12 }
 0x119   :  { %428 = vst [vmem:[%s1266_s5 + $0x70] sm:$0xff] %v412_v16 }
 0x1cf   :  { %v801_v19 = vpop.f32.mrb[0].mxu1 }
 0x1d0   :  { %v608_v20 = vadd.f32 %v801_v19, %v431_v17  ;;  %v528_v21 = vpop.f32.mrb[1].mxu1 }
 0x1d1   :  { %v607_v22 = vadd.f32 %v528_v21, %v430_v18 }
 0x1d2   :  { %624 = vst [vmem:[%s1268_s6 + $0x8] sm:$0xff] %v608_v20 }
 0x1d3   :  { %v804_v25 = vpop.f32.mrb[2].mxu1 }
 0x1d4   :  { %v610_v26 = vadd.f32 %v804_v25, %v433_v23  ;;  %v538_v27 = vpop.f32.mrb[3].mxu1 }
 0x1d7   :  { %v807_v31 = vpop.f32.mrb[4].mxu1 }
 0x1d8   :  { %v548_v33 = vpop.f32.mrb[5].mxu1 }
 0x1d9   :  { %v432_v24 = vld [vmem:[%s1267_s4 + $0x10] sm:$0xff] }
 0x1da   :  { %623 = vst [vmem:[%s1268_s6] sm:$0xff] %v607_v22  ;;  %v609_v28 = vadd.f32 %v538_v27, %v432_v24 }
 0x1db   :  { %v810_v37 = vpop.f32.mrb[6].mxu1 }
 0x1dc   :  { %v558_v39 = vpop.f32.mrb[7].mxu1 }
 0x1df   :  { %v813_v43 = vpop.f32.mrb[8].mxu1 }
 0x1e0   :  { %v568_v45 = vpop.f32.mrb[9].mxu1 }
 0x1e1   :  { %v435_v29 = vld [vmem:[%s1267_s4 + $0x28] sm:$0xff] }
 0x1e2   :  { %626 = vst [vmem:[%s1268_s6 + $0x18] sm:$0xff] %v610_v26  ;;  %v612_v32 = vadd.f32 %v807_v31, %v435_v29 }
 0x1e3   :  { %v816_v49 = vpop.f32.mrb[10].mxu1 }
 0x1e4   :  { %v578_v51 = vpop.f32.mrb[11].mxu1 }
 0x1e7   :  { %v819_v55 = vpop.f32.mrb[12].mxu1 }
 0x1e8   :  { %v588_v57 = vpop.f32.mrb[13].mxu1 }
 0x1e9   :  { %v434_v30 = vld [vmem:[%s1267_s4 + $0x20] sm:$0xff] }
 0x1ea   :  { %625 = vst [vmem:[%s1268_s6 + $0x10] sm:$0xff] %v609_v28  ;;  %v611_v34 = vadd.f32 %v548_v33, %v434_v30 }
 0x1eb   :  { %v822_v61 = vpop.f32.mrb[14].mxu1 }
 0x1ec   :  { %v598_v63 = vpop.f32.mrb[15].mxu1 }
 0x1f1   :  { %v437_v35 = vld [vmem:[%s1267_s4 + $0x38] sm:$0xff] }
 0x1f2   :  { %628 = vst [vmem:[%s1268_s6 + $0x28] sm:$0xff] %v612_v32  ;;  %v614_v38 = vadd.f32 %v810_v37, %v437_v35 }
 0x1f9   :  { %v436_v36 = vld [vmem:[%s1267_s4 + $0x30] sm:$0xff] }
 0x1fa   :  { %627 = vst [vmem:[%s1268_s6 + $0x20] sm:$0xff] %v611_v34  ;;  %v613_v40 = vadd.f32 %v558_v39, %v436_v36 }
 0x201   :  { %v439_v41 = vld [vmem:[%s1267_s4 + $0x48] sm:$0xff] }
 0x202   :  { %630 = vst [vmem:[%s1268_s6 + $0x38] sm:$0xff] %v614_v38  ;;  %v616_v44 = vadd.f32 %v813_v43, %v439_v41 }
 0x209   :  { %v438_v42 = vld [vmem:[%s1267_s4 + $0x40] sm:$0xff] }
 0x20a   :  { %629 = vst [vmem:[%s1268_s6 + $0x30] sm:$0xff] %v613_v40  ;;  %v615_v46 = vadd.f32 %v568_v45, %v438_v42 }
 0x211   :  { %v441_v47 = vld [vmem:[%s1267_s4 + $0x58] sm:$0xff] }
 0x212   :  { %632 = vst [vmem:[%s1268_s6 + $0x48] sm:$0xff] %v616_v44  ;;  %v618_v50 = vadd.f32 %v816_v49, %v441_v47 }
 0x219   :  { %v440_v48 = vld [vmem:[%s1267_s4 + $0x50] sm:$0xff] }
 0x21a   :  { %631 = vst [vmem:[%s1268_s6 + $0x40] sm:$0xff] %v615_v46  ;;  %v617_v52 = vadd.f32 %v578_v51, %v440_v48 }
 0x221   :  { %v443_v53 = vld [vmem:[%s1267_s4 + $0x68] sm:$0xff] }
 0x222   :  { %634 = vst [vmem:[%s1268_s6 + $0x58] sm:$0xff] %v618_v50  ;;  %v620_v56 = vadd.f32 %v819_v55, %v443_v53 }
 0x229   :  { %v442_v54 = vld [vmem:[%s1267_s4 + $0x60] sm:$0xff] }
 0x22a   :  { %633 = vst [vmem:[%s1268_s6 + $0x50] sm:$0xff] %v617_v52  ;;  %v619_v58 = vadd.f32 %v588_v57, %v442_v54 }
 0x231   :  { %v445_v59 = vld [vmem:[%s1267_s4 + $0x78] sm:$0xff] }
 0x232   :  { %636 = vst [vmem:[%s1268_s6 + $0x68] sm:$0xff] %v620_v56  ;;  %v622_v62 = vadd.f32 %v822_v61, %v445_v59 }
 0x239   :  { %v444_v60 = vld [vmem:[%s1267_s4 + $0x70] sm:$0xff] }
 0x23a   :  { %635 = vst [vmem:[%s1268_s6 + $0x60] sm:$0xff] %v619_v58  ;;  %v621_v0 = vadd.f32 %v598_v63, %v444_v60  ;;  %638 = vst [vmem:[%s1268_s6 + $0x78] sm:$0xff] %v622_v62 }
 0x23c   :  { %637 = vst [vmem:[%s1268_s6 + $0x70] sm:$0xff] %v621_v0 }

// kernel: tagconv_forward.5
= control target key start
LH: loop header
LB: loop body
LE: loop exit
PB: predicated region body
PF: predicated region fallthrough
CT: control target
= control target key end

     0   :  { %v930_v5 = vmov 0   ;;  %s1269_s0 = inlined_call_operand.vmem [shape: f32[128,128], index: 0, kind: input, shape index: {}]   ;;  %s1270_s1 = inlined_call_operand.vmem [shape: f32[128,128], index: 1, kind: input, shape index: {}]   ;;  %s1271_s2 = inlined_call_operand.vmem [shape: f32[128,1], index: 2, kind: input, shape index: {}]   ;;  %s1272_s3 = inlined_call_operand.vmem [shape: f32[128,128], index: 3, kind: input, shape index: {}]   ;;  %s1273_s4 = inlined_call_operand.vmem [shape: f32[128,128], index: 4, kind: input, shape index: {}, may-alias: {4,6}]   ;;  %s1274_s5 = inlined_call_operand.hbm [shape: f32[128,128], index: 5, kind: output, shape index: {0}]   ;;  %s1275_s6 = inlined_call_operand.vmem [shape: f32[128,128], index: 6, kind: output, shape index: {1}, may-alias: {4,6}]  }
   0x1   :  { %v75_v0 = vld [vmem:[%s1270_s1] sm:$0xff]  ;;  %v76_v1 = vld [vmem:[%s1270_s1 + $0x8] sm:$0xff]  ;;  %v77_v2 = vld [vmem:[%s1270_s1 + $0x10] sm:$0xff]  ;;  %904 = vset.pattern.permute.xlu0 %v930_v5  ;;  %905 = vset.pattern.permute.xlu1 %v930_v5 }
   0x2   :  { %v836_v3 = vpack.c.bf16 %v76_v1, %v75_v0  ;;  %v78_v4 = vld [vmem:[%s1270_s1 + $0x18] sm:$0xff]  ;;  %v79_v7 = vld [vmem:[%s1270_s1 + $0x20] sm:$0xff]  ;;  %v80_v8 = vld [vmem:[%s1270_s1 + $0x28] sm:$0xff] }
   0x3   :  { %v840_v6 = vpack.c.bf16 %v78_v4, %v77_v2  ;;  %v844_v9 = vpack.c.bf16 %v80_v8, %v79_v7  ;;  %v59_v10 = vld [vmem:[%s1269_s0] sm:$0xff]  ;;  %v81_v11 = vld [vmem:[%s1270_s1 + $0x30] sm:$0xff]  ;;  %v82_v12 = vld [vmem:[%s1270_s1 + $0x38] sm:$0xff] }
   0x4   :  { %837 = vmatprep.subr.bf16.mxu0 %v836_v3  ;;  %756 = vmatprep.mubr.f32.mxu0 %v59_v10  ;;  %v848_v13 = vpack.c.bf16 %v82_v12, %v81_v11  ;;  %v83_v14 = vld [vmem:[%s1270_s1 + $0x40] sm:$0xff]  ;;  %v84_v15 = vld [vmem:[%s1270_s1 + $0x48] sm:$0xff]  ;;  %v273_v17 = vld [vmem:[%s1271_s2 + $0x10] sm:$0xff] }
   0x5   :  { %839 = vmatpush3.bf16.msra.mxu0 %v836_v3  ;;  %v271_v16 = vld [vmem:[%s1271_s2] sm:$0xff]  ;;  %315 = vperm.xlu1 %905, %v273_v17   ;;  %v272_v18 = vld [vmem:[%s1271_s2 + $0x8] sm:$0xff]  ;;  %v852_v19 = vpack.c.bf16 %v84_v15, %v83_v14  ;;  %v274_v20 = vld [vmem:[%s1271_s2 + $0x18] sm:$0xff] }
   0x6   :  { %841 = vmatprep.subr.bf16.mxu0 %v840_v6  ;;  %305 = vperm.xlu0 %904, %v271_v16   ;;  %v85_v21 = vld [vmem:[%s1270_s1 + $0x50] sm:$0xff]  ;;  %v86_v22 = vld [vmem:[%s1270_s1 + $0x58] sm:$0xff]  ;;  %v275_v23 = vld [vmem:[%s1271_s2 + $0x20] sm:$0xff] }
   0x7   :  { %v447_v24 = vld [vmem:[%s1272_s3] sm:$0xff]  ;;  %v448_v25 = vld [vmem:[%s1272_s3 + $0x8] sm:$0xff]  ;;  %v449_v26 = vld [vmem:[%s1272_s3 + $0x10] sm:$0xff]  ;;  %v856_v27 = vpack.c.bf16 %v86_v22, %v85_v21 }
   0x8   :  { %v276_v28 = vld [vmem:[%s1271_s2 + $0x28] sm:$0xff]  ;;  %v868_v29 = vpack.c.bf16 %v448_v25, %v447_v24  ;;  %v450_v30 = vld [vmem:[%s1272_s3 + $0x18] sm:$0xff] }
   0x9   :  { %843 = vmatpush3.bf16.msra.mxu0 %v840_v6  ;;  %320 = vperm.xlu1 %905, %v274_v20  }
   0xa   :  { %845 = vmatprep.subr.bf16.mxu0 %v844_v9  ;;  %310 = vperm.xlu0 %904, %v272_v18  }
   0xd   :  { %847 = vmatpush3.bf16.msra.mxu0 %v844_v9 }
   0xe   :  { %849 = vmatprep.subr.bf16.mxu0 %v848_v13 }
  0x11   :  { %851 = vmatpush3.bf16.msra.mxu0 %v848_v13 }
  0x12   :  { %853 = vmatprep.subr.bf16.mxu0 %v852_v19 }
  0x13   :  { %12 = vsyncpa [#allocation4], 0  ;;  %v87_v31 = vld [vmem:[%s1270_s1 + $0x60] sm:$0xff]  ;;  %v88_v32 = vld [vmem:[%s1270_s1 + $0x68] sm:$0xff]  ;;  %v872_v33 = vpack.c.bf16 %v450_v30, %v449_v26  ;;  %325 = vperm.xlu0 %904, %v275_v23   ;;  %869 = vmatprep.subr.bf16.mxu1 %v868_v29 }
  0x14   :  { %v451_v34 = vld [vmem:[%s1272_s3 + $0x20] sm:$0xff]  ;;  %v452_v35 = vld [vmem:[%s1272_s3 + $0x28] sm:$0xff]  ;;  %330 = vperm.xlu1 %905, %v276_v28   ;;  %v277_v36 = vld [vmem:[%s1271_s2 + $0x30] sm:$0xff]  ;;  %v860_v37 = vpack.c.bf16 %v88_v32, %v87_v31  ;;  %871 = vmatpush3.bf16.msra.mxu1 %v868_v29 }
  0x15   :  { %855 = vmatpush3.bf16.msra.mxu0 %v852_v19  ;;  %v278_v38 = vld [vmem:[%s1271_s2 + $0x38] sm:$0xff]  ;;  %v89_v39 = vld [vmem:[%s1270_s1 + $0x70] sm:$0xff]  ;;  %873 = vmatprep.subr.bf16.mxu1 %v872_v33  ;;  %v876_v41 = vpack.c.bf16 %v452_v35, %v451_v34  ;;  %v279_v44 = vld [vmem:[%s1271_s2 + $0x40] sm:$0xff] }
  0x16   :  { %857 = vmatprep.subr.bf16.mxu0 %v856_v27  ;;  %v90_v40 = vld [vmem:[%s1270_s1 + $0x78] sm:$0xff]  ;;  %v453_v42 = vld [vmem:[%s1272_s3 + $0x30] sm:$0xff]  ;;  %v280_v46 = vld [vmem:[%s1271_s2 + $0x48] sm:$0xff] }
  0x17   :  { %335 = vperm.xlu0 %904, %v277_v36   ;;  %v454_v43 = vld [vmem:[%s1272_s3 + $0x38] sm:$0xff]  ;;  %v864_v45 = vpack.c.bf16 %v90_v40, %v89_v39  ;;  %v455_v48 = vld [vmem:[%s1272_s3 + $0x40] sm:$0xff]  ;;  %v456_v49 = vld [vmem:[%s1272_s3 + $0x48] sm:$0xff] }
  0x18   :  { %340 = vperm.xlu1 %905, %v278_v38   ;;  %875 = vmatpush3.bf16.msra.mxu1 %v872_v33  ;;  %v880_v47 = vpack.c.bf16 %v454_v43, %v453_v42  ;;  %v281_v50 = vld [vmem:[%s1271_s2 + $0x50] sm:$0xff]  ;;  %v282_v51 = vld [vmem:[%s1271_s2 + $0x58] sm:$0xff]  ;;  %v884_v52 = vpack.c.bf16 %v456_v49, %v455_v48  ;;  %v60_v55 = vld [vmem:[%s1269_s0 + $0x8] sm:$0xff] }
  0x19   :  { %859 = vmatpush3.bf16.msra.mxu0 %v856_v27  ;;  %877 = vmatprep.subr.bf16.mxu1 %v876_v41  ;;  %v457_v53 = vld [vmem:[%s1272_s3 + $0x50] sm:$0xff]  ;;  %v458_v54 = vld [vmem:[%s1272_s3 + $0x58] sm:$0xff]  ;;  %v283_v56 = vld [vmem:[%s1271_s2 + $0x60] sm:$0xff] }
  0x1a   :  { %861 = vmatprep.subr.bf16.mxu0 %v860_v37  ;;  %v61_v57 = vld [vmem:[%s1269_s0 + $0x10] sm:$0xff]  ;;  %v284_v58 = vld [vmem:[%s1271_s2 + $0x68] sm:$0xff]  ;;  %v888_v59 = vpack.c.bf16 %v458_v54, %v457_v53  ;;  %v459_v60 = vld [vmem:[%s1272_s3 + $0x60] sm:$0xff] }
  0x1b   :  { %345 = vperm.xlu0 %904, %v279_v44   ;;  %v460_v61 = vld [vmem:[%s1272_s3 + $0x68] sm:$0xff]  ;;  %v62_v62 = vld [vmem:[%s1269_s0 + $0x18] sm:$0xff]  ;;  %v285_v63 = vld [vmem:[%s1271_s2 + $0x70] sm:$0xff] }
  0x1c   :  { %350 = vperm.xlu1 %905, %v280_v46   ;;  %879 = vmatpush3.bf16.msra.mxu1 %v876_v41  ;;  %v63_v0 = vld [vmem:[%s1269_s0 + $0x20] sm:$0xff]  ;;  %v286_v1 = vld [vmem:[%s1271_s2 + $0x78] sm:$0xff]  ;;  %v892_v2 = vpack.c.bf16 %v460_v61, %v459_v60  ;;  %v64_v3 = vld [vmem:[%s1269_s0 + $0x28] sm:$0xff] }
  0x1d   :  { %863 = vmatpush3.bf16.msra.mxu0 %v860_v37  ;;  %881 = vmatprep.subr.bf16.mxu1 %v880_v47  ;;  %v65_v4 = vld [vmem:[%s1269_s0 + $0x30] sm:$0xff]  ;;  %v66_v5 = vld [vmem:[%s1269_s0 + $0x38] sm:$0xff]  ;;  %v67_v6 = vld [vmem:[%s1269_s0 + $0x40] sm:$0xff] }
  0x1e   :  { %865 = vmatprep.subr.bf16.mxu0 %v864_v45  ;;  %v68_v7 = vld [vmem:[%s1269_s0 + $0x48] sm:$0xff]  ;;  %v69_v8 = vld [vmem:[%s1269_s0 + $0x50] sm:$0xff]  ;;  %v70_v9 = vld [vmem:[%s1269_s0 + $0x58] sm:$0xff] }
  0x1f   :  { %355 = vperm.xlu0 %904, %v281_v50   ;;  %v71_v10 = vld [vmem:[%s1269_s0 + $0x60] sm:$0xff]  ;;  %v72_v11 = vld [vmem:[%s1269_s0 + $0x68] sm:$0xff]  ;;  %v73_v12 = vld [vmem:[%s1269_s0 + $0x70] sm:$0xff] }
  0x20   :  { %360 = vperm.xlu1 %905, %v282_v51   ;;  %883 = vmatpush3.bf16.msra.mxu1 %v880_v47  ;;  %v74_v13 = vld [vmem:[%s1269_s0 + $0x78] sm:$0xff]  ;;  %v461_v14 = vld [vmem:[%s1272_s3 + $0x70] sm:$0xff]  ;;  %s931_s0 = smov [#allocation3]  }
  0x21   :  { %867 = vmatpush3.bf16.msra.mxu0 %v864_v45  ;;  %885 = vmatprep.subr.bf16.mxu1 %v884_v52  ;;  %v462_v15 = vld [vmem:[%s1272_s3 + $0x78] sm:$0xff]  ;;  %s645_s3 = sshll.u32 %s931_s0, 4  ;;  %s646_s3 = int_to_ptr.vmem [resolvable:$true] %s645_s3 }
  0x22   :  { %v896_v16 = vpack.c.bf16 %v462_v15, %v461_v14  ;;  %s906_s25 = scalar_lea.vmem %s646_s3, 2048  ;;  %p911_p1 = scmp.lt.s32.totalorder %s646_s3, %s646_s3 }
  0x23   :  { %365 = vperm.xlu0 %904, %v283_v56   ;;  %p907_p0 = scmp.ne.s32.totalorder %s646_s3, %s906_s25  ;;  %p912_p2 = scmp.lt.s32.totalorder %s906_s25, %s906_s25 }
  0x24   :  { %757 = vmatmul.mubr.f32.vlgmr.msra.gmra.mrb[0].mxu0 %v60_v55  ;;  %370 = vperm.xlu1 %905, %v284_v58  }
  0x25   :  { %759 = vmatprep.mubr.f32.mxu0 %v61_v57  ;;  %887 = vmatpush3.bf16.msra.mxu1 %v884_v52  ;;  %p913_p3 = por %p912_p2, %p911_p1 }
  0x26   :  { %889 = vmatprep.subr.bf16.mxu1 %v888_v59 }
  0x27   :  { %375 = vperm.xlu0 %904, %v285_v63   ;;  %p914_p4 = pnand %p913_p3, %p907_p0 }
  0x28   :  { %760 = vmatmul.mubr.f32.gmra.mrb[2].mxu0 %v62_v62  ;;  %380 = vperm.xlu1 %905, %v286_v1  }
  0x29   :  { %762 = vmatprep.mubr.f32.mxu0 %v63_v0  ;;  %891 = vmatpush3.bf16.msra.mxu1 %v888_v59 }
  0x2a   :  { %893 = vmatprep.subr.bf16.mxu1 %v892_v2 }
  0x2c   :  { %763 = vmatmul.mubr.f32.gmra.mrb[4].mxu0 %v64_v3 }
  0x2d   :  { %765 = vmatprep.mubr.f32.mxu0 %v65_v4  ;;  %895 = vmatpush3.bf16.msra.mxu1 %v892_v2 }
  0x2e   :  { %897 = vmatprep.subr.bf16.mxu1 %v896_v16 }
  0x30   :  { %766 = vmatmul.mubr.f32.gmra.mrb[6].mxu0 %v66_v5 }
  0x31   :  { %768 = vmatprep.mubr.f32.mxu0 %v67_v6  ;;  %899 = vmatpush3.bf16.msra.mxu1 %v896_v16 }
  0x34   :  { %769 = vmatmul.mubr.f32.gmra.mrb[8].mxu0 %v68_v7 }
  0x35   :  { %771 = vmatprep.mubr.f32.mxu0 %v69_v8 }
  0x38   :  { %772 = vmatmul.mubr.f32.gmra.mrb[10].mxu0 %v70_v9 }
  0x39   :  { %774 = vmatprep.mubr.f32.mxu0 %v71_v10 }
  0x3c   :  { %775 = vmatmul.mubr.f32.gmra.mrb[12].mxu0 %v72_v11 }
  0x3d   :  { %777 = vmatprep.mubr.f32.mxu0 %v73_v12 }
  0x40   :  { %778 = vmatmul.mubr.f32.gmra.mrb[14].mxu0 %v74_v13 }
  0x84   :  { %v316_v17 = vpop.permute.xlu1 %315 }
  0x85   :  { %v306_v18 = vpop.permute.xlu0 %305 }
  0x88   :  { %v321_v19 = vpop.permute.xlu1 %320 }
  0x89   :  { %v311_v20 = vpop.permute.xlu0 %310 }
  0x92   :  { %v326_v22 = vpop.permute.xlu0 %325 }
  0x93   :  { %v331_v21 = vpop.permute.xlu1 %330 }
  0x96   :  { %v336_v31 = vpop.permute.xlu0 %335 }
  0x97   :  { %v341_v28 = vpop.permute.xlu1 %340 }
  0x9a   :  { %v346_v42 = vpop.permute.xlu0 %345 }
  0x9b   :  { %v351_v40 = vpop.permute.xlu1 %350 }
  0x9e   :  { %v356_v53 = vpop.permute.xlu0 %355 }
  0x9f   :  { %v361_v50 = vpop.permute.xlu1 %360 }
  0xa2   :  { %v366_v0 = vpop.permute.xlu0 %365 }
  0xa3   :  { %v371_v62 = vpop.permute.xlu1 %370 }
  0xa6   :  { %v376_v11 = vpop.permute.xlu0 %375 }
  0xa7   :  { %v381_v8 = vpop.permute.xlu1 %380 }
  0xf7   :  { %v758_v23 = vpop.f32.mrb[0].mxu0 }
  0xf8   :  { %v384_v24 = vmul.f32 %v758_v23, %v311_v20  ;;  %v157_v25 = vpop.f32.mrb[1].mxu0 }
  0xf9   :  { %v383_v26 = vmul.f32 %v306_v18, %v157_v25 }
  0xfa   :  { %v400_v27 = vmul.f32 %v384_v24, %v311_v20 }
  0xfb   :  { %v399_v29 = vmul.f32 %v383_v26, %v306_v18  ;;  %v761_v30 = vpop.f32.mrb[2].mxu0  ;;  %812 = vmatprep.mubr.f32.mxu1 %v383_v26 }
  0xfc   :  { %416 = vst [vmem:[#allocation3 + $0x8] sm:$0xff] %v400_v27  ;;  %v386_v32 = vmul.f32 %v761_v30, %v321_v19  ;;  %v167_v33 = vpop.f32.mrb[3].mxu0  ;;  %813 = vmatmul.mubr.f32.vlgmr.msra.gmra.mrb[0].mxu1 %v384_v24 }
  0xfd   :  { %415 = vst [vmem:[#allocation3] sm:$0xff] %v399_v29  ;;  %v385_v34 = vmul.f32 %v316_v17, %v167_v33 }
  0xfe   :  { %v402_v35 = vmul.f32 %v386_v32, %v321_v19 }
  0xff   :  { %v401_v36 = vmul.f32 %v385_v34, %v316_v17  ;;  %v764_v37 = vpop.f32.mrb[4].mxu0  ;;  %815 = vmatprep.mubr.f32.mxu1 %v385_v34 }
 0x100   :  { %418 = vst [vmem:[#allocation3 + $0x18] sm:$0xff] %v402_v35  ;;  %v388_v38 = vmul.f32 %v764_v37, %v331_v21  ;;  %v177_v39 = vpop.f32.mrb[5].mxu0  ;;  %816 = vmatmul.mubr.f32.gmra.mrb[2].mxu1 %v386_v32 }
 0x101   :  { %417 = vst [vmem:[#allocation3 + $0x10] sm:$0xff] %v401_v36  ;;  %v387_v41 = vmul.f32 %v326_v22, %v177_v39 }
 0x102   :  { %v404_v43 = vmul.f32 %v388_v38, %v331_v21 }
 0x103   :  { %v403_v44 = vmul.f32 %v387_v41, %v326_v22  ;;  %v767_v45 = vpop.f32.mrb[6].mxu0  ;;  %818 = vmatprep.mubr.f32.mxu1 %v387_v41 }
 0x104   :  { %420 = vst [vmem:[#allocation3 + $0x28] sm:$0xff] %v404_v43  ;;  %v390_v46 = vmul.f32 %v767_v45, %v341_v28  ;;  %v187_v47 = vpop.f32.mrb[7].mxu0  ;;  %819 = vmatmul.mubr.f32.gmra.mrb[4].mxu1 %v388_v38 }
 0x105   :  { %419 = vst [vmem:[#allocation3 + $0x20] sm:$0xff] %v403_v44  ;;  %v389_v48 = vmul.f32 %v336_v31, %v187_v47 }
 0x106   :  { %v406_v49 = vmul.f32 %v390_v46, %v341_v28 }
 0x107   :  { %v405_v51 = vmul.f32 %v389_v48, %v336_v31  ;;  %v770_v52 = vpop.f32.mrb[8].mxu0  ;;  %821 = vmatprep.mubr.f32.mxu1 %v389_v48 }
 0x108   :  { %422 = vst [vmem:[#allocation3 + $0x38] sm:$0xff] %v406_v49  ;;  %v392_v54 = vmul.f32 %v770_v52, %v351_v40  ;;  %v197_v55 = vpop.f32.mrb[9].mxu0  ;;  %822 = vmatmul.mubr.f32.gmra.mrb[6].mxu1 %v390_v46 }
 0x109   :  { %421 = vst [vmem:[#allocation3 + $0x30] sm:$0xff] %v405_v51  ;;  %v391_v56 = vmul.f32 %v346_v42, %v197_v55 }
 0x10a   :  { %v408_v57 = vmul.f32 %v392_v54, %v351_v40 }
 0x10b   :  { %v407_v58 = vmul.f32 %v391_v56, %v346_v42  ;;  %v773_v59 = vpop.f32.mrb[10].mxu0  ;;  %824 = vmatprep.mubr.f32.mxu1 %v391_v56 }
 0x10c   :  { %424 = vst [vmem:[#allocation3 + $0x48] sm:$0xff] %v408_v57  ;;  %v394_v60 = vmul.f32 %v773_v59, %v361_v50  ;;  %v207_v61 = vpop.f32.mrb[11].mxu0  ;;  %825 = vmatmul.mubr.f32.gmra.mrb[8].mxu1 %v392_v54 }
 0x10d   :  { %423 = vst [vmem:[#allocation3 + $0x40] sm:$0xff] %v407_v58  ;;  %v393_v63 = vmul.f32 %v356_v53, %v207_v61 }
 0x10e   :  { %v410_v1 = vmul.f32 %v394_v60, %v361_v50 }
 0x10f   :  { %v409_v2 = vmul.f32 %v393_v63, %v356_v53  ;;  %v776_v3 = vpop.f32.mrb[12].mxu0  ;;  %827 = vmatprep.mubr.f32.mxu1 %v393_v63 }
 0x110   :  { %426 = vst [vmem:[#allocation3 + $0x58] sm:$0xff] %v410_v1  ;;  %v396_v4 = vmul.f32 %v776_v3, %v371_v62  ;;  %v217_v5 = vpop.f32.mrb[13].mxu0  ;;  %828 = vmatmul.mubr.f32.gmra.mrb[10].mxu1 %v394_v60 }
 0x111   :  { %425 = vst [vmem:[#allocation3 + $0x50] sm:$0xff] %v409_v2  ;;  %v395_v6 = vmul.f32 %v366_v0, %v217_v5 }
 0x112   :  { %v412_v7 = vmul.f32 %v396_v4, %v371_v62 }
 0x113   :  { %v411_v9 = vmul.f32 %v395_v6, %v366_v0  ;;  %v779_v10 = vpop.f32.mrb[14].mxu0  ;;  %830 = vmatprep.mubr.f32.mxu1 %v395_v6 }
 0x114   :  { %428 = vst [vmem:[#allocation3 + $0x68] sm:$0xff] %v412_v7  ;;  %v398_v12 = vmul.f32 %v779_v10, %v381_v8  ;;  %v227_v13 = vpop.f32.mrb[15].mxu0  ;;  %831 = vmatmul.mubr.f32.gmra.mrb[12].mxu1 %v396_v4 }
 0x115   :  { %427 = vst [vmem:[#allocation3 + $0x60] sm:$0xff] %v411_v9  ;;  %v397_v14 = vmul.f32 %v376_v11, %v227_v13 }
 0x116   :  { %v414_v15 = vmul.f32 %v398_v12, %v381_v8 }
 0x117   :  { %v413_v16 = vmul.f32 %v397_v14, %v376_v11  ;;  %833 = vmatprep.mubr.f32.mxu1 %v397_v14 }
 0x118   :  { %430 = vst [vmem:[#allocation3 + $0x78] sm:$0xff] %v414_v15  ;;  %834 = vmatmul.mubr.f32.gmra.mrb[14].mxu1 %v398_v12 }
 0x119   :  { %429 = vst [vmem:[#allocation3 + $0x70] sm:$0xff] %v413_v16 }
 0x11a   :  { %917 = shalt.err (!%p914_p4)
}
 0x11b   :  { %s918_s28 = scalar_lea.hbm %s1274_s5, 2048 }
 0x11c   :  { %p919_p5 = scmp.ne.s32.totalorder %s1274_s5, %s918_s28  ;;  %p922_p6 = scmp.lt.u32.totalorder %s918_s28, %s1274_s5 }
 0x11e   :  { %p924_p7 = pnand %p922_p6, %p919_p5 }
 0x120   :  { %927 = shalt.err (!%p924_p7)
}
 0x121   :  { %s932_s8 = smov 128   ;;  %s933_s9 = smov 8   ;;  %v432_v17 = vld [vmem:[%s1273_s4 + $0x8] sm:$0xff]  ;;  %v431_v18 = vld [vmem:[%s1273_s4] sm:$0xff]  ;;  %v434_v23 = vld [vmem:[%s1273_s4 + $0x18] sm:$0xff] }
 0x122   :  { %651 = dma.vmem_to_hbm [thread:$0]  %s646_s3, 2048, %s1274_s5, [#allocation4], %s932_s8, %s932_s8, %s933_s9  }
 0x1cf   :  { %v814_v19 = vpop.f32.mrb[0].mxu1 }
 0x1d0   :  { %v609_v20 = vadd.f32 %v814_v19, %v432_v17  ;;  %v529_v21 = vpop.f32.mrb[1].mxu1 }
 0x1d1   :  { %v608_v22 = vadd.f32 %v529_v21, %v431_v18 }
 0x1d2   :  { %625 = vst [vmem:[%s1275_s6 + $0x8] sm:$0xff] %v609_v20 }
 0x1d3   :  { %v817_v25 = vpop.f32.mrb[2].mxu1 }
 0x1d4   :  { %v611_v26 = vadd.f32 %v817_v25, %v434_v23  ;;  %v539_v27 = vpop.f32.mrb[3].mxu1 }
 0x1d7   :  { %v820_v31 = vpop.f32.mrb[4].mxu1 }
 0x1d8   :  { %v549_v33 = vpop.f32.mrb[5].mxu1 }
 0x1d9   :  { %v433_v24 = vld [vmem:[%s1273_s4 + $0x10] sm:$0xff] }
 0x1da   :  { %624 = vst [vmem:[%s1275_s6] sm:$0xff] %v608_v22  ;;  %v610_v28 = vadd.f32 %v539_v27, %v433_v24 }
 0x1db   :  { %v823_v37 = vpop.f32.mrb[6].mxu1 }
 0x1dc   :  { %v559_v39 = vpop.f32.mrb[7].mxu1 }
 0x1df   :  { %v826_v43 = vpop.f32.mrb[8].mxu1 }
 0x1e0   :  { %v569_v45 = vpop.f32.mrb[9].mxu1 }
 0x1e1   :  { %v436_v29 = vld [vmem:[%s1273_s4 + $0x28] sm:$0xff] }
 0x1e2   :  { %627 = vst [vmem:[%s1275_s6 + $0x18] sm:$0xff] %v611_v26  ;;  %v613_v32 = vadd.f32 %v820_v31, %v436_v29 }
 0x1e3   :  { %v829_v49 = vpop.f32.mrb[10].mxu1 }
 0x1e4   :  { %v579_v51 = vpop.f32.mrb[11].mxu1 }
 0x1e7   :  { %v832_v55 = vpop.f32.mrb[12].mxu1 }
 0x1e8   :  { %v589_v57 = vpop.f32.mrb[13].mxu1 }
 0x1e9   :  { %v435_v30 = vld [vmem:[%s1273_s4 + $0x20] sm:$0xff] }
 0x1ea   :  { %626 = vst [vmem:[%s1275_s6 + $0x10] sm:$0xff] %v610_v28  ;;  %v612_v34 = vadd.f32 %v549_v33, %v435_v30 }
 0x1eb   :  { %v835_v61 = vpop.f32.mrb[14].mxu1 }
 0x1ec   :  { %v599_v63 = vpop.f32.mrb[15].mxu1 }
 0x1f1   :  { %v438_v35 = vld [vmem:[%s1273_s4 + $0x38] sm:$0xff] }
 0x1f2   :  { %629 = vst [vmem:[%s1275_s6 + $0x28] sm:$0xff] %v613_v32  ;;  %v615_v38 = vadd.f32 %v823_v37, %v438_v35 }
 0x1f9   :  { %v437_v36 = vld [vmem:[%s1273_s4 + $0x30] sm:$0xff] }
 0x1fa   :  { %628 = vst [vmem:[%s1275_s6 + $0x20] sm:$0xff] %v612_v34  ;;  %v614_v40 = vadd.f32 %v559_v39, %v437_v36 }
 0x201   :  { %v440_v41 = vld [vmem:[%s1273_s4 + $0x48] sm:$0xff] }
 0x202   :  { %631 = vst [vmem:[%s1275_s6 + $0x38] sm:$0xff] %v615_v38  ;;  %v617_v44 = vadd.f32 %v826_v43, %v440_v41 }
 0x209   :  { %v439_v42 = vld [vmem:[%s1273_s4 + $0x40] sm:$0xff] }
 0x20a   :  { %630 = vst [vmem:[%s1275_s6 + $0x30] sm:$0xff] %v614_v40  ;;  %v616_v46 = vadd.f32 %v569_v45, %v439_v42 }
 0x211   :  { %v442_v47 = vld [vmem:[%s1273_s4 + $0x58] sm:$0xff] }
 0x212   :  { %633 = vst [vmem:[%s1275_s6 + $0x48] sm:$0xff] %v617_v44  ;;  %v619_v50 = vadd.f32 %v829_v49, %v442_v47 }
 0x219   :  { %v441_v48 = vld [vmem:[%s1273_s4 + $0x50] sm:$0xff] }
 0x21a   :  { %632 = vst [vmem:[%s1275_s6 + $0x40] sm:$0xff] %v616_v46  ;;  %v618_v52 = vadd.f32 %v579_v51, %v441_v48 }
 0x221   :  { %v444_v53 = vld [vmem:[%s1273_s4 + $0x68] sm:$0xff] }
 0x222   :  { %635 = vst [vmem:[%s1275_s6 + $0x58] sm:$0xff] %v619_v50  ;;  %v621_v56 = vadd.f32 %v832_v55, %v444_v53 }
 0x229   :  { %v443_v54 = vld [vmem:[%s1273_s4 + $0x60] sm:$0xff] }
 0x22a   :  { %634 = vst [vmem:[%s1275_s6 + $0x50] sm:$0xff] %v618_v52  ;;  %v620_v58 = vadd.f32 %v589_v57, %v443_v54 }
 0x231   :  { %v446_v59 = vld [vmem:[%s1273_s4 + $0x78] sm:$0xff] }
 0x232   :  { %637 = vst [vmem:[%s1275_s6 + $0x68] sm:$0xff] %v621_v56  ;;  %v623_v62 = vadd.f32 %v835_v61, %v446_v59 }
 0x239   :  { %v445_v60 = vld [vmem:[%s1273_s4 + $0x70] sm:$0xff] }
 0x23a   :  { %636 = vst [vmem:[%s1275_s6 + $0x60] sm:$0xff] %v620_v58  ;;  %v622_v0 = vadd.f32 %v599_v63, %v445_v60  ;;  %639 = vst [vmem:[%s1275_s6 + $0x78] sm:$0xff] %v623_v62 }
 0x23c   :  { %638 = vst [vmem:[%s1275_s6 + $0x70] sm:$0xff] %v622_v0 }
 0x23d   :  { %928 = dma.done.wait [#allocation4], 2048  }
 0x23e   :  { %929 = vsyncadd [#allocation4], 4294965248 }
 0x23f   :  { %659 = vsyncpa [#allocation4], 1 }

</bundles_post_ra>
